<compile_context>
chip_gen: v5e
topology: v5e:2x2
jax: 0.10.0
libtpu: 0.0.40
codegen_flags: <defaults>
</compile_context>

<pallas_src>
import jax
import jax.numpy as jnp
from jax import lax
from jax.experimental import pallas as pl
from jax.experimental.pallas import tpu as pltpu

# small synthetic sizes consistent with the module's forward
B, T, DV = 2, 16, 32      # batch, num clips, visual feature dim
L, DT = 8, 32             # num words, word embedding dim
H = 32                    # hidden size == config.RANET.PRED_INPUT_SIZE
P = T * T                 # flattened 2D choice map (256)
N_VALID = float(T * (T + 1) // 2)   # static number of valid (j >= i) choices = 136

assert T & (T - 1) == 0, "T must be a power of two for the bit-op mask"
_T_SHIFT = T.bit_length() - 1       # log2(T)

# sublane offsets of each weight inside the packed (224, H) weight block
_OFF_WV = 0
_OFF_WT = _OFF_WV + DV
_OFF_WGS = _OFF_WT + DT
_OFF_WGE = _OFF_WGS + H
_OFF_WI = _OFF_WGE + H
_OFF_WR1 = _OFF_WI + H
_OFF_WR2 = _OFF_WR1 + H
_W_ROWS = _OFF_WR2 + H              # 224

# rows inside the packed (8, H) bias / pred block
_ROW_BV, _ROW_BT, _ROW_BG, _ROW_BI, _ROW_BR, _ROW_BP, _ROW_WP = 0, 1, 2, 3, 4, 5, 6


def ranet_kernel(vis_ref, txt_ref, tmask_ref, w_ref, b_ref, ind_ref, out_ref):
    bb = vis_ref.shape[0]          # samples handled in this grid step
    bp = bb * P

    # packed biases / pred params (rows of an (8, H) block)
    b_all = b_ref[...]
    bv = b_all[_ROW_BV:_ROW_BV + 1, :]
    bt = b_all[_ROW_BT:_ROW_BT + 1, :]
    bg4 = b_all[_ROW_BG:_ROW_BG + 1, :].reshape(1, 1, 1, H)
    bi = b_all[_ROW_BI:_ROW_BI + 1, :]
    br = b_all[_ROW_BR:_ROW_BR + 1, :]
    bpred = b_all[_ROW_BP:_ROW_BP + 1, 0:1]      # (1, 1) scalar pred bias
    wp_row = b_all[_ROW_WP:_ROW_WP + 1, :]       # (1, H) pred weight as a row

    # ---------- encoder_layer ----------
    vis = vis_ref[...].reshape(bb * T, DV)
    vis_h = jnp.maximum(
        jnp.dot(vis, w_ref[_OFF_WV:_OFF_WV + DV, :],
                preferred_element_type=jnp.float32) + bv, 0.0)          # (bb*T, H)

    txt = txt_ref[...].reshape(bb * L, DT)
    tmask3 = tmask_ref[...]                                             # (bb, L, 1)
    txt_f = jnp.maximum(
        jnp.dot(txt, w_ref[_OFF_WT:_OFF_WT + DT, :],
                preferred_element_type=jnp.float32) + bt, 0.0)
    txt_f = txt_f * tmask3.reshape(bb * L, 1)
    denom = jnp.maximum(jnp.sum(tmask3, axis=1), 1.0)                   # (bb, 1)
    txt_h = jnp.sum(txt_f.reshape(bb, L, H), axis=1) / denom            # (bb, H)

    # ---------- generator_layer: 2D choice (proposal) map ----------
    # Projections hoisted above the TxT broadcast: the two matmuls run on bb*T=32
    # rows instead of bb*P=512, then a single broadcast-add builds the map.
    gs = jnp.dot(vis_h, w_ref[_OFF_WGS:_OFF_WGS + H, :],
                 preferred_element_type=jnp.float32)                    # (bb*T, H)
    ge = jnp.dot(vis_h, w_ref[_OFF_WGE:_OFF_WGE + H, :],
                 preferred_element_type=jnp.float32)                    # (bb*T, H)
    choice = jnp.maximum(
        gs.reshape(bb, T, 1, H) + ge.reshape(bb, 1, T, H) + bg4, 0.0)   # (bb, T, T, H)

    # ---------- interactor_layer: Hadamard fusion with sentence feature ----------
    mixed = (choice.reshape(bb, P, H) * txt_h[:, None, :]).reshape(bp, H)
    fused = jnp.maximum(
        jnp.dot(mixed, w_ref[_OFF_WI:_OFF_WI + H, :],
                preferred_element_type=jnp.float32) + bi, 0.0)          # (bp, H)

    # ---------- relation_layer: 1x1 conv + masked global aggregation ----------
    # masked mean over valid choices via an MXU matmul against the precomputed
    # block-diagonal indicator (mask / N_VALID folded in).
    agg = jnp.dot(ind_ref[...], fused, preferred_element_type=jnp.float32)   # (bb, H)
    agg_rel = jnp.dot(agg, w_ref[_OFF_WR2:_OFF_WR2 + H, :],
                      preferred_element_type=jnp.float32)               # (bb, H)
    rel = jnp.maximum(
        (jnp.dot(fused, w_ref[_OFF_WR1:_OFF_WR1 + H, :],
                 preferred_element_type=jnp.float32) + br
         ).reshape(bb, P, H) + agg_rel[:, None, :], 0.0).reshape(bp, H)

    # ---------- pred_layer: Conv2d(H, 1, 1, 1) as (1,H) . rel^T -> lane-dense row ----------
    score = lax.dot_general(wp_row, rel,
                            dimension_numbers=(((1,), (1,)), ((), ())),
                            preferred_element_type=jnp.float32) + bpred  # (1, bp)

    # validity mask (end j >= start i), built with bit ops (T is a power of two)
    q = lax.broadcasted_iota(jnp.int32, (1, bp), 1)
    valid = (q & (T - 1)) >= ((q >> _T_SHIFT) & (T - 1))
    out_ref[...] = jnp.where(valid, score, 0.0)


def init_params(key):
    ks = jax.random.split(key, 14)
    n = lambda k, s: (jax.random.normal(k, s, jnp.float32) * 0.1)
    return [
        n(ks[0], (DV, H)), jnp.zeros((1, H), jnp.float32),    # wv, bv
        n(ks[1], (DT, H)), jnp.zeros((1, H), jnp.float32),    # wt, bt
        n(ks[2], (H, H)), n(ks[3], (H, H)),                   # wgs, wge
        jnp.zeros((1, H), jnp.float32),                       # bg
        n(ks[4], (H, H)), jnp.zeros((1, H), jnp.float32),     # wi, bi
        n(ks[5], (H, H)), n(ks[6], (H, H)),                   # wr1, wr2
        jnp.zeros((1, H), jnp.float32),                       # br
        n(ks[7], (H, 1)), jnp.zeros((1, 1), jnp.float32),     # wp, bpred
    ]


def pack_params(params):
    """Pack 14 small arrays into 2 kernel inputs (done once at trace time)."""
    (wv, bv, wt, bt, wgs, wge, bg, wi, bi, wr1, wr2, br, wp, bpred) = params
    w_small = jnp.concatenate([wv, wt, wgs, wge, wi, wr1, wr2], axis=0)      # (224, H)
    b_small = jnp.concatenate([
        bv, bt, bg, bi, br,
        jnp.broadcast_to(bpred, (1, H)),      # row 5: pred bias (lane 0 used)
        wp.reshape(1, H),                     # row 6: pred weight as a row
        jnp.zeros((1, H), jnp.float32)], axis=0)                             # (8, H)
    return w_small, b_small


def make_indicator(bb):
    """Block-diagonal (bb, bb*P) indicator with the j>=i mask and 1/N_VALID folded in."""
    idx = jnp.arange(T)
    valid = (idx[None, :] >= idx[:, None]).astype(jnp.float32).reshape(P)    # (P,)
    eye = jnp.eye(bb, dtype=jnp.float32)
    return (eye[:, :, None] * valid[None, None, :]).reshape(bb, bb * P) / N_VALID


def _choose_block_batch(batch):
    # Per-sample per-step f32 intermediates: choice/mixed/fused/rel ~ 4 x (P,H) = 128 KiB
    # plus small stuff; the lane-packed output block is only P*4 = 1 KiB/sample.
    # Keep the whole step well inside the default scoped VMEM (16 MiB v5e, 32 MiB
    # v6e/v7x; v7x physical VMEM is 64 MiB, not 128), or raise vmem_limit_bytes.
    per_sample = 192 * 1024
    budget = 8 * 1024 * 1024
    bb = max(1, min(batch, budget // per_sample))
    # TODO(synk): on v7x with batch >= ~8, prefer bb = pl.cdiv(batch, 2) so both
    # TensorCores get a block of the "parallel" grid axis; at batch=2 one step wins.
    while batch % bb:
        bb -= 1
    return bb


def ranet_forward(textual_input, textual_mask, visual_input, params):
    batch = visual_input.shape[0]
    w_small, b_small = pack_params(params)
    bb = _choose_block_batch(batch)
    n_blocks = batch // bb
    indicator = make_indicator(bb)

    # advisory cost hint (all Python ints)
    flops = 2 * batch * (T * DV * H + L * DT * H + 2 * T * H * H
                         + 2 * P * H * H + 2 * P * H + H * H)
    bytes_accessed = 4 * (batch * (T * DV + L * DT + L + P)
                          + _W_ROWS * H + 8 * H + bb * bb * P)

    score_row = pl.pallas_call(
        ranet_kernel,
        out_shape=jax.ShapeDtypeStruct((1, batch * P), jnp.float32),
        grid_spec=pltpu.PrefetchScalarGridSpec(
            num_scalar_prefetch=0,
            grid=(n_blocks,),
            in_specs=[
                pl.BlockSpec((bb, T, DV), lambda b: (b, 0, 0)),
                pl.BlockSpec((bb, L, DT), lambda b: (b, 0, 0)),
                pl.BlockSpec((bb, L, 1), lambda b: (b, 0, 0)),
                pl.BlockSpec((_W_ROWS, H), lambda b: (0, 0)),
                pl.BlockSpec((8, H), lambda b: (0, 0)),
                pl.BlockSpec((bb, bb * P), lambda b: (0, 0)),
            ],
            out_specs=pl.BlockSpec((1, bb * P), lambda b: (0, b)),
        ),
        compiler_params=pltpu.CompilerParams(dimension_semantics=("parallel",)),
        cost_estimate=pl.CostEstimate(flops=flops, transcendentals=0,
                                      bytes_accessed=bytes_accessed),
    )(visual_input, textual_input, textual_mask, w_small, b_small, indicator)

    # glue: lanes hold the flattened (b, i, j) score row; back to NCHW (B, 1, T, T)
    score_map = score_row.reshape(batch, T, T)[:, None, :, :]

    # map_mask is data-independent index arithmetic -> computed in plain JAX
    idx = jnp.arange(T)
    map_mask = (idx[None, :] >= idx[:, None]).astype(jnp.float32)   # valid iff end j >= start i
    map_mask = jnp.broadcast_to(map_mask[None, None, :, :], (batch, 1, T, T))
    return score_map, map_mask


def ranet_reference(textual_input, textual_mask, visual_input, params):
    """Pure-JAX reference with the same simplified-submodule semantics."""
    (wv, bv, wt, bt, wgs, wge, bg, wi, bi, wr1, wr2, br, wp, bpred) = params
    batch = visual_input.shape[0]
    with jax.default_matmul_precision("highest"):
        vis_h = jax.nn.relu(visual_input @ wv + bv)                    # (B, T, H)
        txt_f = jax.nn.relu(textual_input @ wt + bt) * textual_mask    # (B, L, H)
        denom = jnp.maximum(textual_mask.sum(axis=1), 1.0)             # (B, 1)
        txt_h = txt_f.sum(axis=1) / denom                              # (B, H)

        gs = vis_h @ wgs
        ge = vis_h @ wge
        choice = jax.nn.relu(gs[:, :, None, :] + ge[:, None, :, :] + bg)   # (B,T,T,H)

        idx = jnp.arange(T)
        mask = (idx[None, :] >= idx[:, None]).astype(jnp.float32)      # (T, T)

        mixed = choice * txt_h[:, None, None, :]
        fused = jax.nn.relu(mixed @ wi + bi)                           # (B,T,T,H)
        agg = (fused * mask[None, :, :, None]).sum(axis=(1, 2)) / N_VALID   # (B, H)
        agg_rel = agg @ wr2
        rel = jax.nn.relu(fused @ wr1 + br + agg_rel[:, None, None, :])
        score = ((rel @ wp)[..., 0] + bpred[0, 0]) * mask[None, :, :]  # (B, T, T)
    map_mask = jnp.broadcast_to(mask[None, None, :, :], (batch, 1, T, T))
    return score[:, None, :, :], map_mask


if __name__ == "__main__":
    key = jax.random.PRNGKey(0)
    k_v, k_t, k_p = jax.random.split(key, 3)

    visual_input = jax.random.normal(k_v, (B, T, DV), jnp.float32)
    textual_input = jax.random.normal(k_t, (B, L, DT), jnp.float32)
    # first sample: all 8 words valid; second: 5 valid words
    lengths = jnp.array([8, 5], jnp.int32)
    textual_mask = (jnp.arange(L)[None, :] < lengths[:, None]).astype(jnp.float32)[..., None]

    params = init_params(k_p)

    score_map, map_mask = ranet_forward(textual_input, textual_mask, visual_input, params)
    jax.block_until_ready((score_map, map_mask))

    ref_score, ref_mask = ranet_reference(textual_input, textual_mask, visual_input, params)
    jax.block_until_ready((ref_score, ref_mask))

    assert score_map.shape == (B, 1, T, T)
    assert map_mask.shape == (B, 1, T, T)
    assert bool(jnp.all(jnp.isfinite(score_map)))
    assert bool(jnp.all(map_mask == ref_mask))
    assert bool(jnp.allclose(score_map, ref_score, atol=3e-3, rtol=3e-2)), (
        "max abs diff = %f" % float(jnp.max(jnp.abs(score_map - ref_score))))
    print("KERNEL_OK")
</pallas_src>

<mosaic_0001>
module attributes {stable_mosaic.version = 11 : i64} {
  func.func @ranet_kernel(%arg0: i32, %arg1: memref<2x16x32xf32, #tpu.memory_space<vmem>>, %arg2: memref<2x8x32xf32, #tpu.memory_space<vmem>>, %arg3: memref<2x8x1xf32, #tpu.memory_space<vmem>>, %arg4: memref<224x32xf32, #tpu.memory_space<vmem>>, %arg5: memref<8x32xf32, #tpu.memory_space<vmem>>, %arg6: memref<2x512xf32, #tpu.memory_space<vmem>>, %arg7: memref<1x512xf32, #tpu.memory_space<vmem>>) attributes {dimension_semantics = [#tpu.dimension_semantics<parallel>], iteration_bounds = array<i64: 1>, scalar_prefetch = 0 : i64, scratch_operands = 0 : i64, tpu.core_type = #tpu.core_type<tc>, window_params = [{transform_indices = @transform_0, window_bounds = array<i64: 2, 16, 32>}, {transform_indices = @transform_1, window_bounds = array<i64: 2, 8, 32>}, {transform_indices = @transform_2, window_bounds = array<i64: 2, 8, 1>}, {pipeline_mode = #tpu.pipeline_mode<synchronous>, transform_indices = @transform_3, window_bounds = array<i64: 224, 32>}, {pipeline_mode = #tpu.pipeline_mode<synchronous>, transform_indices = @transform_4, window_bounds = array<i64: 8, 32>}, {pipeline_mode = #tpu.pipeline_mode<synchronous>, transform_indices = @transform_5, window_bounds = array<i64: 2, 512>}, {transform_indices = @transform_6, window_bounds = array<i64: 1, 512>}]} {
    %c0 = arith.constant 0 : index
    %c0_0 = arith.constant 0 : index
    %0 = vector.load %arg5[%c0, %c0_0] : memref<8x32xf32, #tpu.memory_space<vmem>>, vector<8x32xf32>
    %1 = vector.extract_strided_slice %0 {offsets = [0, 0], sizes = [1, 32], strides = [1, 1]} : vector<8x32xf32> to vector<1x32xf32>
    %2 = vector.extract_strided_slice %0 {offsets = [1, 0], sizes = [1, 32], strides = [1, 1]} : vector<8x32xf32> to vector<1x32xf32>
    %3 = vector.extract_strided_slice %0 {offsets = [2, 0], sizes = [1, 32], strides = [1, 1]} : vector<8x32xf32> to vector<1x32xf32>
    %4 = vector.shape_cast %3 : vector<1x32xf32> to vector<1x1x1x32xf32>
    %5 = vector.extract_strided_slice %0 {offsets = [3, 0], sizes = [1, 32], strides = [1, 1]} : vector<8x32xf32> to vector<1x32xf32>
    %6 = vector.extract_strided_slice %0 {offsets = [4, 0], sizes = [1, 32], strides = [1, 1]} : vector<8x32xf32> to vector<1x32xf32>
    %7 = vector.extract_strided_slice %0 {offsets = [5, 0], sizes = [1, 1], strides = [1, 1]} : vector<8x32xf32> to vector<1x1xf32>
    %8 = vector.extract_strided_slice %0 {offsets = [6, 0], sizes = [1, 32], strides = [1, 1]} : vector<8x32xf32> to vector<1x32xf32>
    %c0_1 = arith.constant 0 : index
    %c0_2 = arith.constant 0 : index
    %c0_3 = arith.constant 0 : index
    %9 = vector.load %arg1[%c0_1, %c0_2, %c0_3] : memref<2x16x32xf32, #tpu.memory_space<vmem>>, vector<2x16x32xf32>
    %10 = vector.shape_cast %9 : vector<2x16x32xf32> to vector<32x32xf32>
    %c0_4 = arith.constant 0 : index
    %c0_5 = arith.constant 0 : index
    %11 = vector.load %arg4[%c0_4, %c0_5] : memref<224x32xf32, #tpu.memory_space<vmem>>, vector<32x32xf32>
    %cst = arith.constant dense<0.000000e+00> : vector<32x32xf32>
    %12 = tpu.matmul %10, %11, %cst {dimension_numbers = #tpu.dot_dimension_numbers<[1], [0], [0], [1], [0, 0, 1, 1], [], []>} : vector<32x32xf32>, vector<32x32xf32>, vector<32x32xf32> -> vector<32x32xf32>
    %13 = vector.broadcast %1 : vector<1x32xf32> to vector<32x32xf32>
    %14 = arith.addf %12, %13 : vector<32x32xf32>
    %cst_6 = arith.constant 0.000000e+00 : f32
    %15 = vector.broadcast %cst_6 : f32 to vector<32x32xf32>
    %16 = arith.maximumf %14, %15 : vector<32x32xf32>
    %c0_7 = arith.constant 0 : index
    %c0_8 = arith.constant 0 : index
    %c0_9 = arith.constant 0 : index
    %17 = vector.load %arg2[%c0_7, %c0_8, %c0_9] : memref<2x8x32xf32, #tpu.memory_space<vmem>>, vector<2x8x32xf32>
    %18 = vector.shape_cast %17 : vector<2x8x32xf32> to vector<16x32xf32>
    %c0_10 = arith.constant 0 : index
    %c0_11 = arith.constant 0 : index
    %c0_12 = arith.constant 0 : index
    %19 = vector.load %arg3[%c0_10, %c0_11, %c0_12] : memref<2x8x1xf32, #tpu.memory_space<vmem>>, vector<2x8x1xf32>
    %c32 = arith.constant 32 : index
    %c0_13 = arith.constant 0 : index
    %20 = vector.load %arg4[%c32, %c0_13] : memref<224x32xf32, #tpu.memory_space<vmem>>, vector<32x32xf32>
    %cst_14 = arith.constant dense<0.000000e+00> : vector<16x32xf32>
    %21 = tpu.matmul %18, %20, %cst_14 {dimension_numbers = #tpu.dot_dimension_numbers<[1], [0], [0], [1], [0, 0, 1, 1], [], []>} : vector<16x32xf32>, vector<32x32xf32>, vector<16x32xf32> -> vector<16x32xf32>
    %22 = vector.broadcast %2 : vector<1x32xf32> to vector<16x32xf32>
    %23 = arith.addf %21, %22 : vector<16x32xf32>
    %cst_15 = arith.constant 0.000000e+00 : f32
    %24 = vector.broadcast %cst_15 : f32 to vector<16x32xf32>
    %25 = arith.maximumf %23, %24 : vector<16x32xf32>
    %26 = vector.shape_cast %19 : vector<2x8x1xf32> to vector<16x1xf32>
    %27 = vector.broadcast %26 : vector<16x1xf32> to vector<16x32xf32>
    %28 = arith.mulf %25, %27 : vector<16x32xf32>
    %cst_16 = arith.constant dense<0.000000e+00> : vector<2x1xf32>
    %29 = vector.multi_reduction <add>, %19, %cst_16 [1] : vector<2x8x1xf32> to vector<2x1xf32>
    %cst_17 = arith.constant 1.000000e+00 : f32
    %30 = vector.broadcast %cst_17 : f32 to vector<2x1xf32>
    %31 = arith.maximumf %29, %30 : vector<2x1xf32>
    %32 = vector.shape_cast %28 : vector<16x32xf32> to vector<2x8x32xf32>
    %cst_18 = arith.constant dense<0.000000e+00> : vector<2x32xf32>
    %33 = vector.multi_reduction <add>, %32, %cst_18 [1] : vector<2x8x32xf32> to vector<2x32xf32>
    %34 = vector.broadcast %31 : vector<2x1xf32> to vector<2x32xf32>
    %35 = arith.divf %33, %34 : vector<2x32xf32>
    %c64 = arith.constant 64 : index
    %c0_19 = arith.constant 0 : index
    %36 = vector.load %arg4[%c64, %c0_19] : memref<224x32xf32, #tpu.memory_space<vmem>>, vector<32x32xf32>
    %cst_20 = arith.constant dense<0.000000e+00> : vector<32x32xf32>
    %37 = tpu.matmul %16, %36, %cst_20 {dimension_numbers = #tpu.dot_dimension_numbers<[1], [0], [0], [1], [0, 0, 1, 1], [], []>} : vector<32x32xf32>, vector<32x32xf32>, vector<32x32xf32> -> vector<32x32xf32>
    %c96 = arith.constant 96 : index
    %c0_21 = arith.constant 0 : index
    %38 = vector.load %arg4[%c96, %c0_21] : memref<224x32xf32, #tpu.memory_space<vmem>>, vector<32x32xf32>
    %cst_22 = arith.constant dense<0.000000e+00> : vector<32x32xf32>
    %39 = tpu.matmul %16, %38, %cst_22 {dimension_numbers = #tpu.dot_dimension_numbers<[1], [0], [0], [1], [0, 0, 1, 1], [], []>} : vector<32x32xf32>, vector<32x32xf32>, vector<32x32xf32> -> vector<32x32xf32>
    %40 = vector.shape_cast %37 : vector<32x32xf32> to vector<2x16x1x32xf32>
    %41 = vector.shape_cast %39 : vector<32x32xf32> to vector<2x1x16x32xf32>
    %42 = vector.broadcast %40 : vector<2x16x1x32xf32> to vector<2x16x16x32xf32>
    %43 = vector.broadcast %41 : vector<2x1x16x32xf32> to vector<2x16x16x32xf32>
    %44 = arith.addf %42, %43 : vector<2x16x16x32xf32>
    %45 = vector.broadcast %4 : vector<1x1x1x32xf32> to vector<2x16x16x32xf32>
    %46 = arith.addf %44, %45 : vector<2x16x16x32xf32>
    %cst_23 = arith.constant 0.000000e+00 : f32
    %47 = vector.broadcast %cst_23 : f32 to vector<2x16x16x32xf32>
    %48 = arith.maximumf %46, %47 : vector<2x16x16x32xf32>
    %49 = vector.shape_cast %48 : vector<2x16x16x32xf32> to vector<2x256x32xf32>
    %50 = vector.shape_cast %35 : vector<2x32xf32> to vector<2x1x32xf32>
    %51 = vector.broadcast %50 : vector<2x1x32xf32> to vector<2x256x32xf32>
    %52 = arith.mulf %49, %51 : vector<2x256x32xf32>
    %53 = vector.shape_cast %52 : vector<2x256x32xf32> to vector<512x32xf32>
    %c128 = arith.constant 128 : index
    %c0_24 = arith.constant 0 : index
    %54 = vector.load %arg4[%c128, %c0_24] : memref<224x32xf32, #tpu.memory_space<vmem>>, vector<32x32xf32>
    %cst_25 = arith.constant dense<0.000000e+00> : vector<512x32xf32>
    %55 = tpu.matmul %53, %54, %cst_25 {dimension_numbers = #tpu.dot_dimension_numbers<[1], [0], [0], [1], [0, 0, 1, 1], [], []>} : vector<512x32xf32>, vector<32x32xf32>, vector<512x32xf32> -> vector<512x32xf32>
    %56 = vector.broadcast %5 : vector<1x32xf32> to vector<512x32xf32>
    %57 = arith.addf %55, %56 : vector<512x32xf32>
    %cst_26 = arith.constant 0.000000e+00 : f32
    %58 = vector.broadcast %cst_26 : f32 to vector<512x32xf32>
    %59 = arith.maximumf %57, %58 : vector<512x32xf32>
    %c0_27 = arith.constant 0 : index
    %c0_28 = arith.constant 0 : index
    %60 = vector.load %arg6[%c0_27, %c0_28] : memref<2x512xf32, #tpu.memory_space<vmem>>, vector<2x512xf32>
    %cst_29 = arith.constant dense<0.000000e+00> : vector<2x32xf32>
    %61 = tpu.matmul %60, %59, %cst_29 {dimension_numbers = #tpu.dot_dimension_numbers<[1], [0], [0], [1], [0, 0, 1, 1], [], []>} : vector<2x512xf32>, vector<512x32xf32>, vector<2x32xf32> -> vector<2x32xf32>
    %c192 = arith.constant 192 : index
    %c0_30 = arith.constant 0 : index
    %62 = vector.load %arg4[%c192, %c0_30] : memref<224x32xf32, #tpu.memory_space<vmem>>, vector<32x32xf32>
    %cst_31 = arith.constant dense<0.000000e+00> : vector<2x32xf32>
    %63 = tpu.matmul %61, %62, %cst_31 {dimension_numbers = #tpu.dot_dimension_numbers<[1], [0], [0], [1], [0, 0, 1, 1], [], []>} : vector<2x32xf32>, vector<32x32xf32>, vector<2x32xf32> -> vector<2x32xf32>
    %c160 = arith.constant 160 : index
    %c0_32 = arith.constant 0 : index
    %64 = vector.load %arg4[%c160, %c0_32] : memref<224x32xf32, #tpu.memory_space<vmem>>, vector<32x32xf32>
    %cst_33 = arith.constant dense<0.000000e+00> : vector<512x32xf32>
    %65 = tpu.matmul %59, %64, %cst_33 {dimension_numbers = #tpu.dot_dimension_numbers<[1], [0], [0], [1], [0, 0, 1, 1], [], []>} : vector<512x32xf32>, vector<32x32xf32>, vector<512x32xf32> -> vector<512x32xf32>
    %66 = vector.broadcast %6 : vector<1x32xf32> to vector<512x32xf32>
    %67 = arith.addf %65, %66 : vector<512x32xf32>
    %68 = vector.shape_cast %67 : vector<512x32xf32> to vector<2x256x32xf32>
    %69 = vector.shape_cast %63 : vector<2x32xf32> to vector<2x1x32xf32>
    %70 = vector.broadcast %69 : vector<2x1x32xf32> to vector<2x256x32xf32>
    %71 = arith.addf %68, %70 : vector<2x256x32xf32>
    %cst_34 = arith.constant 0.000000e+00 : f32
    %72 = vector.broadcast %cst_34 : f32 to vector<2x256x32xf32>
    %73 = arith.maximumf %71, %72 : vector<2x256x32xf32>
    %74 = vector.shape_cast %73 : vector<2x256x32xf32> to vector<512x32xf32>
    %cst_35 = arith.constant dense<0.000000e+00> : vector<1x512xf32>
    %75 = tpu.matmul %8, %74, %cst_35 {dimension_numbers = #tpu.dot_dimension_numbers<[1], [1], [0], [0], [0, 0, 1, 0], [], []>} : vector<1x32xf32>, vector<512x32xf32>, vector<1x512xf32> -> vector<1x512xf32>
    %76 = vector.broadcast %7 : vector<1x1xf32> to vector<1x512xf32>
    %77 = arith.addf %75, %76 : vector<1x512xf32>
    %78 = tpu.iota {dimensions = array<i32: 1>} : vector<1x512xi32>
    %c15_i32 = arith.constant 15 : i32
    %79 = vector.broadcast %c15_i32 : i32 to vector<1x512xi32>
    %80 = arith.andi %78, %79 : vector<1x512xi32>
    %c4_i32 = arith.constant 4 : i32
    %81 = vector.broadcast %c4_i32 : i32 to vector<1x512xi32>
    %82 = arith.shrsi %78, %81 : vector<1x512xi32>
    %c15_i32_36 = arith.constant 15 : i32
    %83 = vector.broadcast %c15_i32_36 : i32 to vector<1x512xi32>
    %84 = arith.andi %82, %83 : vector<1x512xi32>
    %85 = arith.cmpi sge, %80, %84 : vector<1x512xi32>
    %cst_37 = arith.constant 0.000000e+00 : f32
    %86 = vector.broadcast %cst_37 : f32 to vector<1x512xf32>
    %87 = arith.select %85, %77, %86 : vector<1x512xi1>, vector<1x512xf32>
    %c0_38 = arith.constant 0 : index
    %c0_39 = arith.constant 0 : index
    %88 = vector.load %arg7[%c0_38, %c0_39] : memref<1x512xf32, #tpu.memory_space<vmem>>, vector<1x512xf32>
    tpu.vector_store %arg7[%c0_38, %c0_39], %87 {strides = array<i32>} : memref<1x512xf32, #tpu.memory_space<vmem>>, vector<1x512xf32>,
    return
  }
  func.func @transform_0(%arg0: i32) -> (i32, i32, i32) {
    %c0_i32 = arith.constant 0 : i32
    %c0_i32_0 = arith.constant 0 : i32
    %c0_i32_1 = arith.constant 0 : i32
    return %arg0, %c0_i32, %c0_i32_0 : i32, i32, i32
  }
  func.func @transform_1(%arg0: i32) -> (i32, i32, i32) {
    %c0_i32 = arith.constant 0 : i32
    %c0_i32_0 = arith.constant 0 : i32
    %c0_i32_1 = arith.constant 0 : i32
    return %arg0, %c0_i32, %c0_i32_0 : i32, i32, i32
  }
  func.func @transform_2(%arg0: i32) -> (i32, i32, i32) {
    %c0_i32 = arith.constant 0 : i32
    %c0_i32_0 = arith.constant 0 : i32
    %c0_i32_1 = arith.constant 0 : i32
    return %arg0, %c0_i32, %c0_i32_0 : i32, i32, i32
  }
  func.func @transform_3(%arg0: i32) -> (i32, i32) {
    %c0_i32 = arith.constant 0 : i32
    %c0_i32_0 = arith.constant 0 : i32
    %c0_i32_1 = arith.constant 0 : i32
    return %c0_i32, %c0_i32_0 : i32, i32
  }
  func.func @transform_4(%arg0: i32) -> (i32, i32) {
    %c0_i32 = arith.constant 0 : i32
    %c0_i32_0 = arith.constant 0 : i32
    %c0_i32_1 = arith.constant 0 : i32
    return %c0_i32, %c0_i32_0 : i32, i32
  }
  func.func @transform_5(%arg0: i32) -> (i32, i32) {
    %c0_i32 = arith.constant 0 : i32
    %c0_i32_0 = arith.constant 0 : i32
    %c0_i32_1 = arith.constant 0 : i32
    return %c0_i32, %c0_i32_0 : i32, i32
  }
  func.func @transform_6(%arg0: i32) -> (i32, i32) {
    %c0_i32 = arith.constant 0 : i32
    %c0_i32_0 = arith.constant 0 : i32
    return %c0_i32, %arg0 : i32, i32
  }
}

</mosaic_0001>

<bundles_post_ra>
// kernel: tpu_custom_call.1
= control target key start
LH: loop header
LB: loop body
LE: loop exit
PB: predicated region body
PF: predicated region fallthrough
CT: control target
= control target key end

     0   :  { %v2358_v2 = vmov 0   ;;  %vm132_vm0 = vcmask 7168   ;;  %vm34_vm1 = vcmask 261120   ;;  %s3836_s0 = inlined_call_operand.vmem [shape: f32[2,16,32], index: 0, kind: input, shape index: {}]   ;;  %s3837_s1 = inlined_call_operand.vmem [shape: f32[2,8,32], index: 1, kind: input, shape index: {}]   ;;  %s3838_s2 = inlined_call_operand.vmem [shape: f32[2,8,1], index: 2, kind: input, shape index: {}]   ;;  %s3839_s3 = inlined_call_operand.vmem [shape: f32[224,32], index: 3, kind: input, shape index: {}]   ;;  %s3840_s4 = inlined_call_operand.vmem [shape: f32[8,32], index: 4, kind: input, shape index: {}]   ;;  %s3841_s5 = inlined_call_operand.vmem [shape: f32[2,512], index: 5, kind: input, shape index: {}]   ;;  %s3842_s6 = inlined_call_operand.hbm [shape: f32[1,512], index: 6, kind: output, shape index: {}]  }
   0x1   :  { %v32_v0 = vld [vmem:[%s3839_s3 + $0x18] sm:$0xff]  ;;  %v31_v1 = vld [vmem:[%s3839_s3 + $0x10] sm:$0xff]  ;;  %2324 = vset.pattern.permute.xlu0 %v2358_v2  ;;  %v30_v3 = vld [vmem:[%s3839_s3 + $0x8] sm:$0xff]  ;;  %2325 = vset.pattern.permute.xlu1 %v2358_v2 }
   0x2   :  { %59 = vmatpush.msra.mxu2 %v32_v0  ;;  %v87_v4 = vld [vmem:[%s3839_s3 + $0x38] sm:$0xff]  ;;  %2326 = vset.pattern.permute.xlu2 %v2358_v2  ;;  %v29_v5 = vld [vmem:[%s3839_s3] sm:$0xff]  ;;  %v86_v6 = vld [vmem:[%s3839_s3 + $0x30] sm:$0xff] }
   0x3   :  { %107 = vmatpush.msra.mxu1 %v87_v4  ;;  %v25_v7 = vld [vmem:[%s3836_s0] sm:$0xff]  ;;  %v85_v8 = vld [vmem:[%s3839_s3 + $0x28] sm:$0xff]  ;;  %v251_v11 = vld [vmem:[%s3839_s3 + $0x78] sm:$0xff] }
   0x4   :  { %60 = vmatpush.msra.mxu2 %v31_v1  ;;  %v82_v9 = vld [vmem:[%s3838_s2] sm:$0xff] }
   0x5   :  { %108 = vmatpush.msra.mxu1 %v86_v6  ;;  %v133_v10 = vsel %vm132_vm0, %v82_v9, 0.0  ;;  %v2429_v12 = vld [vmem:[%s3840_s4] sm:$0xff] }
   0x6   :  { %61 = vmatpush.msra.mxu2 %v30_v3 }
   0x7   :  { %11 = vsyncpa [#allocation3], 0  ;;  %v84_v13 = vld [vmem:[%s3839_s3 + $0x20] sm:$0xff]  ;;  %v134_v14 = vrot.slane %v133_v10, 4  ;;  %v206_v15 = vld [vmem:[%s3839_s3 + $0x58] sm:$0xff]  ;;  %264 = vmatpush.msra.mxu3 %v251_v11  ;;  %1764 = vperm.xlu2 %2326, %v2429_v12   ;;  %v33_v33 = vperm.slane %v2429_v12, 0 }
   0x8   :  { %62 = vmatpush.msra.mxu2 %v29_v5  ;;  %109 = vmatpush.msra.mxu1 %v85_v8  ;;  %v80_v16 = vld [vmem:[%s3837_s1] sm:$0xff]  ;;  %v26_v20 = vld [vmem:[%s3836_s0 + $0x8] sm:$0xff]  ;;  %v27_v24 = vld [vmem:[%s3836_s0 + $0x10] sm:$0xff]  ;;  %v88_v56 = vperm.slane %v2429_v12, 1  ;;  %vm2075_vm14 = vcmask 1040384   ;;  %vm2077_vm15 = vcmask 1042434  }
   0x9   :  { %2103 = vmatmul.msk.f32.vlgmr.msra.gmra.mxu2 %vm34_vm1, %v25_v7  ;;  %v135_v17 = vadd.f32 %v134_v14, %v133_v10  ;;  %v28_v25 = vld [vmem:[%s3836_s0 + $0x18] sm:$0xff]  ;;  %v205_v26 = vld [vmem:[%s3839_s3 + $0x50] sm:$0xff]  ;;  %v204_v28 = vld [vmem:[%s3839_s3 + $0x48] sm:$0xff]  ;;  %s2094_s22 = sshll.u32 %s3842_s6, 4  ;;  %s2095_s22 = int_to_ptr.hbm [resolvable:$true] %s2094_s22 }
   0xa   :  { %110 = vmatpush.msra.mxu1 %v84_v13  ;;  %231 = vmatpush.msrb.mxu2 %v206_v15  ;;  %v250_v27 = vld [vmem:[%s3839_s3 + $0x70] sm:$0xff]  ;;  %v249_v29 = vld [vmem:[%s3839_s3 + $0x68] sm:$0xff]  ;;  %v248_v30 = vld [vmem:[%s3839_s3 + $0x60] sm:$0xff] }
   0xb   :  { %2107 = vmatmul.msk.f32.vlgmr.msra.gmra.mxu1 %vm34_vm1, %v80_v16  ;;  %v136_v18 = vrot.slane %v135_v17, 2  ;;  %265 = vmatpush.msra.mxu3 %v250_v27  ;;  %v203_v31 = vld [vmem:[%s3839_s3 + $0x40] sm:$0xff]  ;;  %v81_v32 = vld [vmem:[%s3837_s1 + $0x8] sm:$0xff]  ;;  %v637_v59 = vld [vmem:[%s3839_s3 + $0x98] sm:$0xff] }
   0xc   :  { %232 = vmatpush.msrb.mxu2 %v205_v26  ;;  %v83_v34 = vld [vmem:[%s3838_s2 + $0x8] sm:$0xff]  ;;  %v636_v60 = vld [vmem:[%s3839_s3 + $0x90] sm:$0xff]  ;;  %843 = vmatpush.msra.mxu0 %v637_v59  ;;  %v634_v1 = vld [vmem:[%s3839_s3 + $0x80] sm:$0xff] }
   0xd   :  { %v137_v19 = vadd.f32 %v136_v18, %v135_v17  ;;  %266 = vmatpush.msra.mxu3 %v249_v29  ;;  %v140_v35 = vsel %vm132_vm0, %v83_v34, 0.0  ;;  %2314 = vmatpush.msrb.mxu1 %v637_v59  ;;  %v635_v63 = vld [vmem:[%s3839_s3 + $0x88] sm:$0xff]  ;;  %vm2079_vm0 = vcmask 1041408  }
   0xe   :  { %233 = vmatpush.msrb.mxu2 %v204_v28  ;;  %v141_v36 = vrot.slane %v140_v35, 4  ;;  %844 = vmatpush.msra.mxu0 %v636_v60 }
   0xf   :  { %v138_v21 = vrot.slane %v137_v19, 1  ;;  %267 = vmatpush.msra.mxu3 %v248_v30  ;;  %2315 = vmatpush.msrb.mxu1 %v636_v60 }
  0x10   :  { %234 = vmatpush.msrb.mxu2 %v203_v31  ;;  %v142_v39 = vadd.f32 %v141_v36, %v140_v35  ;;  %845 = vmatpush.msra.mxu0 %v635_v63 }
  0x11   :  { %2104 = vmatmul.msk.f32.gmra.mxu2 %vm34_vm1, %v26_v20  ;;  %v139_v22 = vadd.f32 %v138_v21, %v137_v19  ;;  %2316 = vmatpush.msrb.mxu1 %v635_v63  ;;  %v2511_v19 = vperm.slane %v2429_v12, 2 }
  0x12   :  { %v143_v41 = vrot.slane %v142_v39, 2  ;;  %846 = vmatpush.msra.mxu0 %v634_v1 }
  0x13   :  { %v147_v23 = vmax.f32 %v139_v22, 1.0  ;;  %2108 = vmatmul.msk.f32.gmra.mxu1 %vm34_vm1, %v81_v32 }
  0x14   :  { %v144_v42 = vadd.f32 %v143_v41, %v142_v39  ;;  %2317 = vmatpush.msrb.mxu1 %v634_v1 }
  0x15   :  { %165 = vperm.xlu0 %2324, %v147_v23  }
  0x16   :  { %v145_v43 = vrot.slane %v144_v42, 1 }
  0x18   :  { %v146_v46 = vadd.f32 %v145_v43, %v144_v42 }
  0x19   :  { %2105 = vmatmul.msk.f32.gmra.mxu2 %vm34_vm1, %v27_v24 }
  0x1a   :  { %v148_v48 = vmax.f32 %v146_v46, 1.0 }
  0x1c   :  { %170 = vperm.xlu1 %2325, %v148_v48  }
  0x1d   :  { %122 = vperm.xlu0 %2324, %v82_v9  }
  0x21   :  { %2106 = vmatmul.msk.f32.gmra.mxu2 %vm34_vm1, %v28_v25 }
  0x24   :  { %127 = vperm.xlu1 %2325, %v83_v34  }
  0x87   :  { %v166_v55 = vpop.permute.xlu0 %165 }
  0x88   :  { %v112_v57 = vpop.f32.mrf.mxu1  ;;  %2327 = vrcp.f32 %v166_v55  ;;  %vm178_vm2 = vweird.f32 %v166_v55  ;;  %v184_v11 = vand.u32 2147483648, %v166_v55  ;;  %v182_v14 = vand.u32 2147483647, %v166_v55 }
  0x89   :  { %v113_v58 = vadd.f32 %v112_v57, %v88_v56 }
  0x8a   :  { %v185_v16 = vor.u32 1.1754944e-38, %v184_v11  ;;  %vm183_vm5 = vcmp.eq.f32.partialorder %v182_v14, 8.507059e+37 }
  0x8b   :  { %v118_v61 = vmax.f32 %v113_v58, 0.0 }
  0x8c   :  { %v64_v37 = vpop.f32.mrf.mxu2 }
  0x8d   :  { %v65_v38 = vadd.f32 %v64_v37, %v33_v33 }
  0x8e   :  { %v2328_v3 = vpop.eup %2327 }
  0x8f   :  { %v76_v40 = vmax.f32 %v65_v38, 0.0  ;;  %v123_v62 = vpop.permute.xlu0 %122  ;;  %v174_v5 = vmul.f32 %v2328_v3, %v166_v55  ;;  %vm179_vm3 = vweird.f32 %v2328_v3 }
  0x90   :  { %v130_v0 = vmul.f32 %v123_v62, %v118_v61  ;;  %vm180_vm4 = vmor %vm178_vm2, %vm179_vm3 }
  0x91   :  { %2109 = vmatmul.msk.f32.vlgmr.msrb.gmra.mxu2 %vm34_vm1, %v76_v40  ;;  %2113 = vmatmul.msk.f32.vlgmr.msra.gmra.mxu3 %vm34_vm1, %v76_v40  ;;  %v175_v7 = vsub.f32 1.0, %v174_v5 }
  0x92   :  { %v149_v2 = vsel %vm34_vm1, %v130_v0, 0.0 }
  0x93   :  { %v150_v4 = vrot.slane %v149_v2, 4  ;;  %v176_v9 = vmul.f32 %v2328_v3, %v175_v7 }
  0x94   :  { %v67_v44 = vpop.f32.mrf.mxu2 }
  0x95   :  { %v68_v45 = vadd.f32 %v67_v44, %v33_v33  ;;  %v151_v6 = vadd.f32 %v150_v4, %v149_v2  ;;  %v177_v13 = vadd.f32 %v2328_v3, %v176_v9 }
  0x97   :  { %v77_v47 = vmax.f32 %v68_v45, 0.0  ;;  %v152_v8 = vrot.slane %v151_v6, 2  ;;  %v181_v20 = vsel %vm180_vm4, %v2328_v3, %v177_v13 }
  0x98   :  { %v186_v24 = vsel %vm183_vm5, %v185_v16, %v181_v20 }
  0x99   :  { %2110 = vmatmul.msk.f32.gmra.mxu2 %vm34_vm1, %v77_v47  ;;  %2114 = vmatmul.msk.f32.gmra.mxu3 %vm34_vm1, %v77_v47  ;;  %v153_v10 = vadd.f32 %v152_v8, %v151_v6 }
  0x9b   :  { %v154_v15 = vrot.slane %v153_v10, 1 }
  0x9c   :  { %v70_v49 = vpop.f32.mrf.mxu2 }
  0x9d   :  { %v71_v50 = vadd.f32 %v70_v49, %v33_v33  ;;  %v155_v22 = vadd.f32 %v154_v15, %v153_v10 }
  0x9f   :  { %v78_v51 = vmax.f32 %v71_v50, 0.0  ;;  %v2517_v27 = vmul.f32 %v186_v24, %v155_v22 }
  0xa1   :  { %2111 = vmatmul.msk.f32.gmra.mxu2 %vm34_vm1, %v78_v51  ;;  %2115 = vmatmul.msk.f32.gmra.mxu3 %vm34_vm1, %v78_v51 }
  0xa4   :  { %v73_v52 = vpop.f32.mrf.mxu2 }
  0xa5   :  { %v74_v53 = vadd.f32 %v73_v52, %v33_v33 }
  0xa7   :  { %v79_v54 = vmax.f32 %v74_v53, 0.0 }
  0xa9   :  { %2112 = vmatmul.msk.f32.gmra.mxu2 %vm34_vm1, %v79_v54  ;;  %2116 = vmatmul.msk.f32.gmra.mxu3 %vm34_vm1, %v79_v54 }
 0x114   :  { %v2506_v17 = vpop.f32.mrf.mxu2  ;;  %v2508_v18 = vpop.f32.mrf.mxu3 }
 0x115   :  { %v313_v21 = vperm.slane %v2506_v17, 0  ;;  %v285_v26 = vrot.slane %v2506_v17, 1  ;;  %v286_v51 = vrot.slane %v2506_v17, 2  ;;  %v287_v8 = vrot.slane %v2506_v17, 3 }
 0x117   :  { %v377_v23 = vadd.f32 %v313_v21, %v2508_v18  ;;  %v314_v34 = vperm.slane %v285_v26, 0  ;;  %v315_v57 = vperm.slane %v286_v51, 0  ;;  %v316_v14 = vperm.slane %v287_v8, 0 }
 0x119   :  { %v442_v25 = vadd.f32 %v2511_v19, %v377_v23  ;;  %v379_v39 = vadd.f32 %v314_v34, %v2508_v18  ;;  %v381_v61 = vadd.f32 %v315_v57, %v2508_v18 }
 0x11b   :  { %v506_v28 = vmax.f32 %v442_v25, 0.0  ;;  %v444_v45 = vadd.f32 %v2511_v19, %v379_v39  ;;  %v446_v2 = vadd.f32 %v2511_v19, %v381_v61 }
 0x11c   :  { %v2519_v29 = vpop.f32.mrf.mxu2  ;;  %v2521_v30 = vpop.f32.mrf.mxu3 }
 0x11d   :  { %v570_v31 = vmul.f32 %v506_v28, %v2517_v27  ;;  %v378_v32 = vadd.f32 %v313_v21, %v2521_v30  ;;  %v294_v33 = vrot.slane %v2519_v29, 3  ;;  %v295_v42 = vrot.slane %v2519_v29, 4 }
 0x11e   :  { %v508_v49 = vmax.f32 %v444_v45, 0.0  ;;  %v380_v50 = vadd.f32 %v314_v34, %v2521_v30  ;;  %v296_v0 = vrot.slane %v2519_v29, 5  ;;  %v510_v6 = vmax.f32 %v446_v2, 0.0  ;;  %v115_v34 = vpop.f32.mrf.mxu1 }
 0x11f   :  { %2117 = vmatmul.msk.f32.vlgmr.msra.gmra.mxu0 %vm34_vm1, %v570_v31  ;;  %v443_v35 = vadd.f32 %v2511_v19, %v378_v32  ;;  %v324_v36 = vperm.slane %v294_v33, 0  ;;  %v325_v48 = vperm.slane %v295_v42, 0  ;;  %v382_v7 = vadd.f32 %v315_v57, %v2521_v30  ;;  %v2573_v31 = vpop.permute.xlu1 %170 }
 0x120   :  { %v572_v54 = vmul.f32 %v508_v49, %v2517_v27  ;;  %v445_v55 = vadd.f32 %v2511_v19, %v380_v50  ;;  %v326_v5 = vperm.slane %v296_v0, 0  ;;  %v574_v11 = vmul.f32 %v510_v6, %v2517_v27 }
 0x121   :  { %v507_v37 = vmax.f32 %v443_v35, 0.0  ;;  %v399_v38 = vadd.f32 %v324_v36, %v2508_v18  ;;  %v400_v41 = vadd.f32 %v324_v36, %v2521_v30  ;;  %v401_v53 = vadd.f32 %v325_v48, %v2508_v18 }
 0x122   :  { %v509_v60 = vmax.f32 %v445_v55, 0.0  ;;  %v402_v63 = vadd.f32 %v325_v48, %v2521_v30  ;;  %v403_v10 = vadd.f32 %v326_v5, %v2508_v18  ;;  %v447_v13 = vadd.f32 %v2511_v19, %v382_v7 }
 0x123   :  { %v464_v40 = vadd.f32 %v2511_v19, %v399_v38  ;;  %v571_v43 = vmul.f32 %v507_v37, %v2517_v27  ;;  %v465_v47 = vadd.f32 %v2511_v19, %v400_v41  ;;  %v466_v59 = vadd.f32 %v2511_v19, %v401_v53 }
 0x124   :  { %v573_v1 = vmul.f32 %v509_v60, %v2517_v27  ;;  %v467_v4 = vadd.f32 %v2511_v19, %v402_v63  ;;  %v468_v16 = vadd.f32 %v2511_v19, %v403_v10  ;;  %v511_v20 = vmax.f32 %v447_v13, 0.0 }
 0x125   :  { %v528_v44 = vmax.f32 %v464_v40, 0.0  ;;  %v529_v52 = vmax.f32 %v465_v47, 0.0  ;;  %v530_v62 = vmax.f32 %v466_v59, 0.0  ;;  %v383_v21 = vadd.f32 %v316_v14, %v2508_v18 }
 0x126   :  { %v531_v9 = vmax.f32 %v467_v4, 0.0  ;;  %v532_v22 = vmax.f32 %v468_v16, 0.0  ;;  %v404_v23 = vadd.f32 %v326_v5, %v2521_v30  ;;  %v297_v24 = vrot.slane %v2519_v29, 6 }
 0x127   :  { %2118 = vmatmul.msk.f32.gmra.mxu0 %vm34_vm1, %v571_v43  ;;  %v592_v46 = vmul.f32 %v528_v44, %v2517_v27  ;;  %v593_v58 = vmul.f32 %v529_v52, %v2517_v27  ;;  %v594_v3 = vmul.f32 %v530_v62, %v2517_v27  ;;  %v575_v25 = vmul.f32 %v511_v20, %v2517_v27  ;;  %v128_v47 = vpop.permute.xlu1 %127 }
 0x128   :  { %v595_v15 = vmul.f32 %v531_v9, %v2517_v27  ;;  %v448_v26 = vadd.f32 %v2511_v19, %v383_v21  ;;  %v596_v28 = vmul.f32 %v532_v22, %v2517_v27  ;;  %v469_v32 = vadd.f32 %v2511_v19, %v404_v23  ;;  %v2614_v23 = vpop.f32.mrf.mxu2 }
 0x129   :  { %2139 = vmatmul.msk.f32.vlgmr.msrb.gmra.mxu1 %vm34_vm1, %v592_v46  ;;  %v327_v33 = vperm.slane %v297_v24, 0  ;;  %v384_v36 = vadd.f32 %v316_v14, %v2521_v30  ;;  %v288_v37 = vrot.slane %v2506_v17, 4  ;;  %v116_v40 = vadd.f32 %v115_v34, %v88_v56  ;;  %v2616_v24 = vpop.f32.mrf.mxu3 }
 0x12a   :  { %v512_v35 = vmax.f32 %v448_v26, 0.0  ;;  %v533_v38 = vmax.f32 %v469_v32, 0.0  ;;  %v298_v51 = vrot.slane %v2519_v29, 7  ;;  %2329 = vrcp.f32 %v2573_v31 }
 0x12b   :  { %v405_v39 = vadd.f32 %v327_v33, %v2508_v18  ;;  %v449_v42 = vadd.f32 %v2511_v19, %v384_v36  ;;  %v317_v43 = vperm.slane %v288_v37, 0  ;;  %v119_v46 = vmax.f32 %v116_v40, 0.0 }
 0x12c   :  { %v576_v41 = vmul.f32 %v512_v35, %v2517_v27  ;;  %v597_v44 = vmul.f32 %v533_v38, %v2517_v27  ;;  %v406_v56 = vadd.f32 %v327_v33, %v2521_v30  ;;  %v289_v62 = vrot.slane %v2506_v17, 5 }
 0x12d   :  { %v470_v45 = vadd.f32 %v2511_v19, %v405_v39  ;;  %v513_v48 = vmax.f32 %v449_v42, 0.0  ;;  %v385_v49 = vadd.f32 %v317_v43, %v2508_v18  ;;  %v131_v52 = vmul.f32 %v128_v47, %v119_v46 }
 0x12e   :  { %v471_v57 = vadd.f32 %v2511_v19, %v406_v56  ;;  %v386_v61 = vadd.f32 %v317_v43, %v2521_v30  ;;  %v318_v6 = vperm.slane %v289_v62, 0  ;;  %vm193_vm6 = vweird.f32 %v2573_v31 }
 0x12f   :  { %2119 = vmatmul.msk.f32.gmra.mxu0 %vm34_vm1, %v572_v54  ;;  %v534_v50 = vmax.f32 %v470_v45, 0.0  ;;  %v577_v53 = vmul.f32 %v513_v48, %v2517_v27  ;;  %v450_v54 = vadd.f32 %v2511_v19, %v385_v49  ;;  %v156_v59 = vsel %vm34_vm1, %v131_v52, 0.0 }
 0x130   :  { %v2330_v63 = vpop.eup %2329  ;;  %v157_v0 = vrot.slane %v156_v59, 4  ;;  %v451_v5 = vadd.f32 %v2511_v19, %v386_v61  ;;  %v387_v13 = vadd.f32 %v318_v6, %v2508_v18  ;;  %v329_v32 = vperm.slane %v2614_v23, 0 }
 0x131   :  { %2140 = vmatmul.msk.f32.gmra.mxu1 %vm34_vm1, %v593_v58  ;;  %v598_v55 = vmul.f32 %v534_v50, %v2517_v27  ;;  %v328_v58 = vperm.slane %v298_v51, 0  ;;  %v514_v60 = vmax.f32 %v450_v54, 0.0  ;;  %vm194_vm7 = vweird.f32 %v2330_v63  ;;  %v2636_v50 = vpop.f32.mrf.mxu3 }
 0x132   :  { %v158_v7 = vadd.f32 %v157_v0, %v156_v59  ;;  %v452_v22 = vadd.f32 %v2511_v19, %v387_v13  ;;  %v199_v33 = vand.u32 2147483648, %v2573_v31  ;;  %v290_v34 = vrot.slane %v2506_v17, 6  ;;  %vm195_vm8 = vmor %vm193_vm6, %vm194_vm7 }
 0x133   :  { %v407_v2 = vadd.f32 %v328_v58, %v2508_v18  ;;  %v578_v4 = vmul.f32 %v514_v60, %v2517_v27  ;;  %v408_v16 = vadd.f32 %v328_v58, %v2521_v30  ;;  %v197_v36 = vand.u32 2147483647, %v2573_v31 }
 0x134   :  { %v159_v14 = vrot.slane %v158_v7, 2  ;;  %v516_v37 = vmax.f32 %v452_v22, 0.0  ;;  %v388_v38 = vadd.f32 %v318_v6, %v2521_v30  ;;  %v200_v42 = vor.u32 1.1754944e-38, %v199_v33 }
 0x135   :  { %v472_v9 = vadd.f32 %v2511_v19, %v407_v2  ;;  %v319_v43 = vperm.slane %v290_v34, 0  ;;  %vm198_vm9 = vcmp.eq.f32.partialorder %v197_v36, 8.507059e+37  ;;  %v410_v54 = vadd.f32 %v329_v32, %v2636_v50 }
 0x136   :  { %v580_v45 = vmul.f32 %v516_v37, %v2517_v27  ;;  %v453_v46 = vadd.f32 %v2511_v19, %v388_v38  ;;  %v291_v0 = vrot.slane %v2506_v17, 7  ;;  %v321_v33 = vperm.slane %v2519_v29, 0 }
 0x137   :  { %2120 = vmatmul.msk.f32.gmra.mxu0 %vm34_vm1, %v573_v1  ;;  %v535_v1 = vmax.f32 %v471_v57, 0.0  ;;  %v389_v51 = vadd.f32 %v319_v43, %v2508_v18  ;;  %v475_v60 = vadd.f32 %v2511_v19, %v410_v54 }
 0x138   :  { %v517_v56 = vmax.f32 %v453_v46, 0.0  ;;  %v393_v37 = vadd.f32 %v321_v33, %v2508_v18 }
 0x139   :  { %2141 = vmatmul.msk.f32.gmra.mxu1 %vm34_vm1, %v594_v3  ;;  %v189_v3 = vmul.f32 %v2330_v63, %v2573_v31  ;;  %v599_v8 = vmul.f32 %v535_v1, %v2517_v27  ;;  %v454_v58 = vadd.f32 %v2511_v19, %v389_v51  ;;  %v539_v1 = vmax.f32 %v475_v60, 0.0 }
 0x13a   :  { %v581_v57 = vmul.f32 %v517_v56, %v2517_v27 }
 0x13b   :  { %v190_v10 = vsub.f32 1.0, %v189_v3  ;;  %v518_v62 = vmax.f32 %v454_v58, 0.0 }
 0x13d   :  { %v191_v20 = vmul.f32 %v2330_v63, %v190_v10  ;;  %v582_v3 = vmul.f32 %v518_v62, %v2517_v27  ;;  %v302_v62 = vrot.slane %v2614_v23, 4 }
 0x13f   :  { %2121 = vmatmul.msk.f32.gmra.mxu0 %vm34_vm1, %v574_v11  ;;  %v515_v11 = vmax.f32 %v451_v5, 0.0  ;;  %v192_v35 = vadd.f32 %v2330_v63, %v191_v20  ;;  %v320_v5 = vperm.slane %v291_v0, 0 }
 0x141   :  { %2142 = vmatmul.msk.f32.gmra.mxu1 %vm34_vm1, %v595_v15  ;;  %v536_v15 = vmax.f32 %v472_v9, 0.0  ;;  %v579_v21 = vmul.f32 %v515_v11, %v2517_v27  ;;  %v391_v9 = vadd.f32 %v320_v5, %v2508_v18  ;;  %v300_v11 = vrot.slane %v2614_v23, 2 }
 0x142   :  { %v392_v22 = vadd.f32 %v320_v5, %v2521_v30  ;;  %v333_v5 = vperm.slane %v302_v62, 0 }
 0x143   :  { %v600_v26 = vmul.f32 %v536_v15, %v2517_v27  ;;  %v331_v20 = vperm.slane %v300_v11, 0 }
 0x147   :  { %2122 = vmatmul.msk.f32.gmra.mxu0 %vm34_vm1, %v575_v25  ;;  %v160_v25 = vadd.f32 %v159_v14, %v158_v7  ;;  %v456_v14 = vadd.f32 %v2511_v19, %v391_v9 }
 0x149   :  { %2143 = vmatmul.msk.f32.gmra.mxu1 %vm34_vm1, %v596_v28  ;;  %v473_v28 = vadd.f32 %v2511_v19, %v408_v16  ;;  %v161_v39 = vrot.slane %v160_v25, 1 }
 0x14b   :  { %v537_v40 = vmax.f32 %v473_v28, 0.0  ;;  %v162_v47 = vadd.f32 %v161_v39, %v160_v25  ;;  %v414_v39 = vadd.f32 %v331_v20, %v2636_v50 }
 0x14d   :  { %v601_v48 = vmul.f32 %v537_v40, %v2517_v27  ;;  %v301_v40 = vrot.slane %v2614_v23, 3 }
 0x14f   :  { %2123 = vmatmul.msk.f32.gmra.mxu0 %vm34_vm1, %v576_v41  ;;  %v409_v41 = vadd.f32 %v329_v32, %v2616_v24  ;;  %v457_v32 = vadd.f32 %v2511_v19, %v392_v22 }
 0x151   :  { %2144 = vmatmul.msk.f32.gmra.mxu1 %vm34_vm1, %v597_v44  ;;  %v196_v44 = vsel %vm195_vm8, %v2330_v63, %v192_v35  ;;  %v474_v31 = vadd.f32 %v2511_v19, %v409_v41  ;;  %v390_v63 = vadd.f32 %v319_v43, %v2521_v30  ;;  %v521_v36 = vmax.f32 %v457_v32, 0.0 }
 0x152   :  { %v201_v49 = vsel %vm198_vm9, %v200_v42, %v196_v44  ;;  %v458_v42 = vadd.f32 %v2511_v19, %v393_v37  ;;  %v479_v44 = vadd.f32 %v2511_v19, %v414_v39 }
 0x153   :  { %v2640_v52 = vmul.f32 %v201_v49, %v162_v47  ;;  %v585_v41 = vmul.f32 %v521_v36, %v2517_v27  ;;  %v394_v47 = vadd.f32 %v321_v33, %v2521_v30 }
 0x154   :  { %v522_v46 = vmax.f32 %v458_v42, 0.0 }
 0x155   :  { %v603_v6 = vmul.f32 %v539_v1, %v2640_v52 }
 0x156   :  { %v586_v51 = vmul.f32 %v522_v46, %v2517_v27 }
 0x157   :  { %2124 = vmatmul.msk.f32.gmra.mxu0 %vm34_vm1, %v577_v53  ;;  %v538_v53 = vmax.f32 %v474_v31, 0.0  ;;  %v543_v31 = vmax.f32 %v479_v44, 0.0 }
 0x159   :  { %2145 = vmatmul.msk.f32.gmra.mxu1 %vm34_vm1, %v598_v55  ;;  %v299_v55 = vrot.slane %v2614_v23, 1  ;;  %v602_v59 = vmul.f32 %v538_v53, %v2640_v52  ;;  %v459_v53 = vadd.f32 %v2511_v19, %v394_v47 }
 0x15b   :  { %v330_v61 = vperm.slane %v299_v55, 0  ;;  %v607_v55 = vmul.f32 %v543_v31, %v2640_v52  ;;  %v523_v58 = vmax.f32 %v459_v53, 0.0  ;;  %v304_v31 = vrot.slane %v2614_v23, 6 }
 0x15d   :  { %v411_v2 = vadd.f32 %v330_v61, %v2616_v24  ;;  %v412_v10 = vadd.f32 %v330_v61, %v2636_v50  ;;  %v587_v0 = vmul.f32 %v523_v58, %v2517_v27 }
 0x15f   :  { %2125 = vmatmul.msk.f32.gmra.mxu0 %vm34_vm1, %v578_v4  ;;  %v455_v4 = vadd.f32 %v2511_v19, %v390_v63  ;;  %v476_v7 = vadd.f32 %v2511_v19, %v411_v2  ;;  %v477_v16 = vadd.f32 %v2511_v19, %v412_v10 }
 0x161   :  { %2146 = vmatmul.msk.f32.gmra.mxu1 %vm34_vm1, %v599_v8  ;;  %v519_v8 = vmax.f32 %v455_v4, 0.0  ;;  %v540_v17 = vmax.f32 %v476_v7, 0.0  ;;  %v541_v25 = vmax.f32 %v477_v16, 0.0 }
 0x163   :  { %v583_v13 = vmul.f32 %v519_v8, %v2517_v27  ;;  %v604_v15 = vmul.f32 %v540_v17, %v2640_v52  ;;  %v605_v34 = vmul.f32 %v541_v25, %v2640_v52  ;;  %v293_v8 = vrot.slane %v2519_v29, 2 }
 0x164   :  { %v417_v17 = vadd.f32 %v333_v5, %v2616_v24  ;;  %v418_v25 = vadd.f32 %v333_v5, %v2636_v50 }
 0x166   :  { %v483_v36 = vadd.f32 %v2511_v19, %v418_v25 }
 0x167   :  { %2126 = vmatmul.msk.f32.gmra.mxu0 %vm34_vm1, %v579_v21  ;;  %v520_v21 = vmax.f32 %v456_v14, 0.0  ;;  %v323_v14 = vperm.slane %v293_v8, 0 }
 0x168   :  { %v547_v39 = vmax.f32 %v483_v36, 0.0 }
 0x169   :  { %2147 = vmatmul.msk.f32.gmra.mxu1 %vm34_vm1, %v600_v26  ;;  %v413_v26 = vadd.f32 %v331_v20, %v2616_v24  ;;  %v584_v28 = vmul.f32 %v520_v21, %v2517_v27  ;;  %v482_v20 = vadd.f32 %v2511_v19, %v417_v17  ;;  %v397_v21 = vadd.f32 %v323_v14, %v2508_v18 }
 0x16b   :  { %v478_v35 = vadd.f32 %v2511_v19, %v413_v26  ;;  %v546_v22 = vmax.f32 %v482_v20, 0.0  ;;  %v303_v26 = vrot.slane %v2614_v23, 5  ;;  %v462_v33 = vadd.f32 %v2511_v19, %v397_v21  ;;  %v2779_v21 = vpop.f32.mrf.mxu2 }
 0x16d   :  { %v542_v38 = vmax.f32 %v478_v35, 0.0  ;;  %v610_v35 = vmul.f32 %v546_v22, %v2640_v52  ;;  %v526_v37 = vmax.f32 %v462_v33, 0.0 }
 0x16f   :  { %2127 = vmatmul.msk.f32.gmra.mxu0 %vm34_vm1, %v580_v45  ;;  %v606_v43 = vmul.f32 %v542_v38, %v2640_v52  ;;  %v332_v45 = vperm.slane %v301_v40, 0  ;;  %v398_v38 = vadd.f32 %v323_v14, %v2521_v30  ;;  %v590_v42 = vmul.f32 %v526_v37, %v2517_v27 }
 0x171   :  { %2148 = vmatmul.msk.f32.gmra.mxu1 %vm34_vm1, %v601_v48  ;;  %v292_v48 = vrot.slane %v2519_v29, 1  ;;  %v415_v49 = vadd.f32 %v332_v45, %v2616_v24  ;;  %v416_v61 = vadd.f32 %v332_v45, %v2636_v50  ;;  %v611_v45 = vmul.f32 %v547_v39, %v2640_v52 }
 0x173   :  { %v322_v54 = vperm.slane %v292_v48, 0  ;;  %v481_v4 = vadd.f32 %v2511_v19, %v416_v61 }
 0x175   :  { %v396_v7 = vadd.f32 %v322_v54, %v2521_v30  ;;  %v545_v9 = vmax.f32 %v481_v4, 0.0 }
 0x177   :  { %2128 = vmatmul.msk.f32.gmra.mxu0 %vm34_vm1, %v581_v57  ;;  %v480_v57 = vadd.f32 %v2511_v19, %v415_v49  ;;  %v609_v16 = vmul.f32 %v545_v9, %v2640_v52 }
 0x179   :  { %2149 = vmatmul.msk.f32.gmra.mxu1 %vm34_vm1, %v602_v59  ;;  %v395_v59 = vadd.f32 %v322_v54, %v2508_v18  ;;  %v544_v60 = vmax.f32 %v480_v57, 0.0  ;;  %v334_v18 = vperm.slane %v303_v26, 0  ;;  %v335_v57 = vperm.slane %v304_v31, 0 }
 0x17b   :  { %v460_v1 = vadd.f32 %v2511_v19, %v395_v59  ;;  %v419_v40 = vadd.f32 %v334_v18, %v2616_v24  ;;  %v420_v48 = vadd.f32 %v334_v18, %v2636_v50  ;;  %v421_v59 = vadd.f32 %v335_v57, %v2616_v24 }
 0x17c   :  { %v2789_v18 = vperm.slane %v2429_v12, 3  ;;  %v306_v12 = vrot.slane %v2779_v21, 1 }
 0x17d   :  { %v484_v46 = vadd.f32 %v2511_v19, %v419_v40 }
 0x17f   :  { %2129 = vmatmul.msk.f32.gmra.mxu0 %vm34_vm1, %v582_v3  ;;  %v608_v3 = vmul.f32 %v544_v60, %v2640_v52  ;;  %v548_v47 = vmax.f32 %v484_v46, 0.0 }
 0x181   :  { %2150 = vmatmul.msk.f32.gmra.mxu1 %vm34_vm1, %v603_v6  ;;  %v524_v6 = vmax.f32 %v460_v1, 0.0  ;;  %v612_v54 = vmul.f32 %v548_v47, %v2640_v52  ;;  %v422_v1 = vadd.f32 %v335_v57, %v2636_v50  ;;  %v338_v57 = vperm.slane %v306_v12, 0 }
 0x183   :  { %v588_v11 = vmul.f32 %v524_v6, %v2517_v27 }
 0x187   :  { %2130 = vmatmul.msk.f32.gmra.mxu0 %vm34_vm1, %v583_v13  ;;  %v461_v13 = vadd.f32 %v2511_v19, %v396_v7  ;;  %v487_v7 = vadd.f32 %v2511_v19, %v422_v1 }
 0x189   :  { %2151 = vmatmul.msk.f32.gmra.mxu1 %vm34_vm1, %v604_v15  ;;  %v525_v29 = vmax.f32 %v461_v13, 0.0  ;;  %v551_v9 = vmax.f32 %v487_v7, 0.0 }
 0x18b   :  { %v589_v32 = vmul.f32 %v525_v29, %v2517_v27  ;;  %v615_v14 = vmul.f32 %v551_v9, %v2640_v52 }
 0x18f   :  { %2131 = vmatmul.msk.f32.gmra.mxu0 %vm34_vm1, %v584_v28 }
 0x191   :  { %2152 = vmatmul.msk.f32.gmra.mxu1 %vm34_vm1, %v605_v34 }
 0x197   :  { %2132 = vmatmul.msk.f32.gmra.mxu0 %vm34_vm1, %v585_v41 }
 0x199   :  { %2153 = vmatmul.msk.f32.gmra.mxu1 %vm34_vm1, %v606_v43  ;;  %v463_v43 = vadd.f32 %v2511_v19, %v398_v38 }
 0x19b   :  { %v527_v30 = vmax.f32 %v463_v43, 0.0 }
 0x19c   :  { %v2689_v56 = vpop.f32.mrf.mxu0 }
 0x19f   :  { %2133 = vmatmul.msk.f32.gmra.mxu0 %vm34_vm1, %v586_v51  ;;  %v591_v51 = vmul.f32 %v527_v30, %v2517_v27  ;;  %v486_v27 = vadd.f32 %v2511_v19, %v421_v59 }
 0x1a1   :  { %2154 = vmatmul.msk.f32.gmra.mxu1 %vm34_vm1, %v607_v55  ;;  %v485_v55 = vadd.f32 %v2511_v19, %v420_v48 }
 0x1a3   :  { %v549_v58 = vmax.f32 %v485_v55, 0.0 }
 0x1a4   :  { %v2700_v63 = vpop.f32.mrf.mxu0 }
 0x1a5   :  { %v613_v62 = vmul.f32 %v549_v58, %v2640_v52 }
 0x1a6   :  { %v2704_v2 = vpop.f32.mrf.mxu1 }
 0x1a7   :  { %2134 = vmatmul.msk.f32.gmra.mxu0 %vm34_vm1, %v587_v0  ;;  %v550_v0 = vmax.f32 %v486_v27, 0.0 }
 0x1a9   :  { %2155 = vmatmul.msk.f32.gmra.mxu1 %vm34_vm1, %v608_v3  ;;  %v305_v3 = vrot.slane %v2614_v23, 7  ;;  %v614_v6 = vmul.f32 %v550_v0, %v2640_v52 }
 0x1ab   :  { %v336_v8 = vperm.slane %v305_v3, 0 }
 0x1ac   :  { %v2713_v10 = vpop.f32.mrf.mxu0 }
 0x1ad   :  { %v423_v17 = vadd.f32 %v336_v8, %v2616_v24  ;;  %v424_v20 = vadd.f32 %v336_v8, %v2636_v50  ;;  %v2857_v8 = vadd.f32 %v2704_v2, %v2789_v18 }
 0x1ae   :  { %v2717_v15 = vpop.f32.mrf.mxu1 }
 0x1af   :  { %2135 = vmatmul.msk.f32.gmra.mxu0 %vm34_vm1, %v588_v11  ;;  %v488_v23 = vadd.f32 %v2511_v19, %v423_v17  ;;  %v489_v26 = vadd.f32 %v2511_v19, %v424_v20 }
 0x1b1   :  { %2156 = vmatmul.msk.f32.gmra.mxu1 %vm34_vm1, %v609_v16  ;;  %v552_v16 = vmax.f32 %v488_v23, 0.0  ;;  %v553_v33 = vmax.f32 %v489_v26, 0.0  ;;  %v428_v23 = vadd.f32 %v338_v57, %v2636_v50 }
 0x1b3   :  { %v616_v25 = vmul.f32 %v552_v16, %v2640_v52  ;;  %v617_v40 = vmul.f32 %v553_v33, %v2640_v52  ;;  %v307_v16 = vrot.slane %v2779_v21, 2  ;;  %v493_v26 = vadd.f32 %v2511_v19, %v428_v23 }
 0x1b4   :  { %v2726_v28 = vpop.f32.mrf.mxu0 }
 0x1b5   :  { %v557_v33 = vmax.f32 %v493_v26, 0.0 }
 0x1b6   :  { %v2730_v34 = vpop.f32.mrf.mxu1 }
 0x1b7   :  { %2136 = vmatmul.msk.f32.gmra.mxu0 %vm34_vm1, %v589_v32  ;;  %v337_v32 = vperm.slane %v2779_v21, 0 }
 0x1b9   :  { %2157 = vmatmul.msk.f32.gmra.mxu1 %vm34_vm1, %v610_v35  ;;  %v425_v35 = vadd.f32 %v337_v32, %v2616_v24  ;;  %v426_v48 = vadd.f32 %v337_v32, %v2636_v50  ;;  %v339_v32 = vperm.slane %v307_v16, 0 }
 0x1bc   :  { %v2738_v41 = vpop.f32.mrf.mxu0 }
 0x1be   :  { %v2742_v44 = vpop.f32.mrf.mxu1 }
 0x1bf   :  { %2137 = vmatmul.msk.f32.gmra.mxu0 %vm34_vm1, %v590_v42  ;;  %v490_v42 = vadd.f32 %v2511_v19, %v425_v35  ;;  %v2832_v27 = vadd.f32 %v2742_v44, %v2789_v18  ;;  %v427_v44 = vadd.f32 %v338_v57, %v2616_v24  ;;  %v429_v35 = vadd.f32 %v339_v32, %v2616_v24 }
 0x1c0   :  { %v308_v57 = vrot.slane %v2779_v21, 3 }
 0x1c1   :  { %2158 = vmatmul.msk.f32.gmra.mxu1 %vm34_vm1, %v611_v45  ;;  %v554_v47 = vmax.f32 %v490_v42, 0.0  ;;  %v3873_v7 = vmax.f32 %v2832_v27, 0.0  ;;  %v621_v42 = vmul.f32 %v557_v33, %v2640_v52  ;;  %v494_v12 = vadd.f32 %v2511_v19, %v429_v35 }
 0x1c2   :  { %v340_v16 = vperm.slane %v308_v57, 0 }
 0x1c4   :  { %v2750_v49 = vpop.f32.mrf.mxu0 }
 0x1c6   :  { %v926_v53 = vpop.f32.mrf.mxu1 }
 0x1c7   :  { %2138 = vmatmul.msk.f32.gmra.mxu0 %vm34_vm1, %v591_v51  ;;  %v2823_v58 = vadd.f32 %v926_v53, %v2789_v18  ;;  %v2840_v53 = vadd.f32 %v2730_v34, %v2789_v18 }
 0x1c9   :  { %2159 = vmatmul.msk.f32.gmra.mxu1 %vm34_vm1, %v612_v54  ;;  %3895 = vst [vmem:[#allocation5_spill] sm:$0xff] %v2840_v53  ;;  %v3871_v1 = vmax.f32 %v2823_v58, 0.0  ;;  %v3843_v9 = vmax.f32 %v2840_v53, 0.0 }
 0x1cc   :  { %v2758_v60 = vpop.f32.mrf.mxu0 }
 0x1ce   :  { %v929_v61 = vpop.f32.mrf.mxu1 }
 0x1cf   :  { %v2815_v51 = vadd.f32 %v929_v61, %v2789_v18  ;;  %v491_v61 = vadd.f32 %v2511_v19, %v426_v48  ;;  %v558_v48 = vmax.f32 %v494_v12, 0.0 }
 0x1d1   :  { %2160 = vmatmul.msk.f32.gmra.mxu1 %vm34_vm1, %v613_v62  ;;  %v618_v62 = vmul.f32 %v554_v47, %v2640_v52  ;;  %v3870_v0 = vmax.f32 %v2815_v51, 0.0  ;;  %v555_v3 = vmax.f32 %v491_v61, 0.0  ;;  %v430_v47 = vadd.f32 %v339_v32, %v2636_v50 }
 0x1d2   :  { %v622_v23 = vmul.f32 %v558_v48, %v2640_v52 }
 0x1d3   :  { %v619_v17 = vmul.f32 %v555_v3, %v2640_v52 }
 0x1d4   :  { %v2765_v4 = vpop.f32.mrf.mxu0 }
 0x1d6   :  { %v932_v5 = vpop.f32.mrf.mxu1 }
 0x1d7   :  { %v2806_v46 = vadd.f32 %v932_v5, %v2789_v18 }
 0x1d9   :  { %2161 = vmatmul.msk.f32.gmra.mxu1 %vm34_vm1, %v614_v6  ;;  %v3868_v59 = vmax.f32 %v2806_v46, 0.0  ;;  %v2848_v6 = vadd.f32 %v2717_v15, %v2789_v18  ;;  %v492_v15 = vadd.f32 %v2511_v19, %v427_v44  ;;  %v3900_v53 = vmax.f32 %v2806_v46, 0.0 }
 0x1db   :  { %3896 = vst [vmem:[#allocation6_spill] sm:$0xff] %v2848_v6  ;;  %v556_v2 = vmax.f32 %v492_v15, 0.0 }
 0x1dc   :  { %v2771_v11 = vpop.f32.mrf.mxu0 }
 0x1dd   :  { %v2939_v57 = vadd.f32 %v2771_v11, %v2789_v18 }
 0x1de   :  { %v935_v13 = vpop.f32.mrf.mxu1 }
 0x1df   :  { %v2800_v43 = vadd.f32 %v935_v13, %v2789_v18  ;;  %v3844_v13 = vmax.f32 %v2848_v6, 0.0 }
 0x1e1   :  { %2162 = vmatmul.msk.f32.gmra.mxu1 %vm34_vm1, %v615_v14  ;;  %v3864_v54 = vmax.f32 %v2800_v43, 0.0  ;;  %v3845_v14 = vmax.f32 %v2857_v8, 0.0 }
 0x1e4   :  { %v2777_v29 = vpop.f32.mrf.mxu0 }
 0x1e5   :  { %v2930_v12 = vadd.f32 %v2777_v29, %v2789_v18  ;;  %v309_v29 = vrot.slane %v2779_v21, 4 }
 0x1e6   :  { %v938_v22 = vpop.f32.mrf.mxu1 }
 0x1e7   :  { %v2792_v38 = vadd.f32 %v938_v22, %v2789_v18 }
 0x1e9   :  { %2163 = vmatmul.msk.f32.gmra.mxu1 %vm34_vm1, %v616_v25  ;;  %v3863_v30 = vmax.f32 %v2792_v38, 0.0  ;;  %v620_v25 = vmul.f32 %v556_v2, %v2640_v52 }
 0x1ec   :  { %v2786_v36 = vpop.f32.mrf.mxu0 }
 0x1ee   :  { %v941_v37 = vpop.f32.mrf.mxu1 }
 0x1ef   :  { %v2795_v39 = vadd.f32 %v941_v37, %v2789_v18 }
 0x1f1   :  { %v3861_v45 = vmax.f32 %v2795_v39, 0.0  ;;  %2164 = vmatmul.msk.f32.gmra.mxu1 %vm34_vm1, %v617_v40 }
 0x1f3   :  { %1135 = vmatpush.msra.mxu2 %v3861_v45 }
 0x1f4   :  { %v2812_v31 = vpop.f32.mrf.mxu0 }
 0x1f5   :  { %1136 = vmatpush.msra.mxu2 %v3863_v30  ;;  %v2911_v32 = vadd.f32 %v2812_v31, %v2789_v18 }
 0x1f6   :  { %v2820_v55 = vpop.f32.mrf.mxu1 }
 0x1f7   :  { %1137 = vmatpush.msra.mxu2 %v3864_v54 }
 0x1f9   :  { %2165 = vmatmul.msk.f32.gmra.mxu1 %vm34_vm1, %v618_v62  ;;  %1138 = vmatpush.msra.mxu2 %v3868_v59  ;;  %v312_v59 = vrot.slane %v2779_v21, 7 }
 0x1fb   :  { %1139 = vmatpush.msra.mxu2 %v3870_v0  ;;  %v344_v0 = vperm.slane %v312_v59, 0 }
 0x1fc   :  { %v884_v5 = vpop.f32.mrf.mxu0 }
 0x1fd   :  { %1140 = vmatpush.msra.mxu2 %v3871_v1  ;;  %v439_v1 = vadd.f32 %v344_v0, %v2616_v24 }
 0x1fe   :  { %v2853_v34 = vpop.f32.mrf.mxu1 }
 0x1ff   :  { %1141 = vmatpush.msra.mxu2 %v3873_v7 }
 0x201   :  { %2166 = vmatmul.msk.f32.gmra.mxu1 %vm34_vm1, %v619_v17  ;;  %1142 = vmatpush.msra.mxu2 %v3843_v9  ;;  %v495_v17 = vadd.f32 %v2511_v19, %v430_v47  ;;  %v3850_v47 = vmax.f32 %v2911_v32, 0.0  ;;  %v3853_v9 = vmax.f32 %v2939_v57, 0.0 }
 0x203   :  { %1143 = vmatpush.msra.mxu2 %v3844_v13  ;;  %v559_v33 = vmax.f32 %v495_v17, 0.0  ;;  %v2948_v17 = vadd.f32 %v2765_v4, %v2789_v18  ;;  %v341_v13 = vperm.slane %v309_v29, 0 }
 0x204   :  { %v887_v20 = vpop.f32.mrf.mxu0 }
 0x205   :  { %1144 = vmatpush.msra.mxu2 %v3845_v14  ;;  %v2898_v15 = vadd.f32 %v887_v20, %v2789_v18  ;;  %v623_v48 = vmul.f32 %v559_v33, %v2640_v52  ;;  %v432_v33 = vadd.f32 %v340_v16, %v2636_v50  ;;  %v2967_v14 = vadd.f32 %v2750_v49, %v2789_v18 }
 0x206   :  { %v2875_v22 = vpop.f32.mrf.mxu1  ;;  %v2984_v49 = vadd.f32 %v2726_v28, %v2789_v18 }
 0x207   :  { %v3848_v20 = vmax.f32 %v2898_v15, 0.0  ;;  %v3856_v29 = vmax.f32 %v2967_v14, 0.0 }
 0x209   :  { %2167 = vmatmul.msk.f32.gmra.mxu1 %vm34_vm1, %v620_v25  ;;  %v2903_v25 = vadd.f32 %v884_v5, %v2789_v18  ;;  %v431_v5 = vadd.f32 %v340_v16, %v2616_v24  ;;  %v3854_v16 = vmax.f32 %v2948_v17, 0.0 }
 0x20c   :  { %v890_v37 = vpop.f32.mrf.mxu0 }
 0x20d   :  { %v2889_v61 = vadd.f32 %v890_v37, %v2789_v18  ;;  %v2921_v37 = vadd.f32 %v2786_v36, %v2789_v18  ;;  %v496_v36 = vadd.f32 %v2511_v19, %v431_v5 }
 0x20e   :  { %v2881_v40 = vpop.f32.mrf.mxu1 }
 0x20f   :  { %v3847_v26 = vmax.f32 %v2889_v61, 0.0  ;;  %v560_v11 = vmax.f32 %v496_v36, 0.0  ;;  %v497_v36 = vadd.f32 %v2511_v19, %v432_v33 }
 0x211   :  { %2168 = vmatmul.msk.f32.gmra.mxu1 %vm34_vm1, %v621_v42  ;;  %v3849_v42 = vmax.f32 %v2903_v25, 0.0 }
 0x214   :  { %v893_v62 = vpop.f32.mrf.mxu0 }
 0x215   :  { %v2892_v3 = vadd.f32 %v893_v62, %v2789_v18  ;;  %v3851_v62 = vmax.f32 %v2921_v37, 0.0 }
 0x216   :  { %v2894_v44 = vpop.f32.mrf.mxu1 }
 0x217   :  { %v3846_v2 = vmax.f32 %v2892_v3, 0.0 }
 0x219   :  { %2169 = vmatmul.msk.f32.gmra.mxu1 %vm34_vm1, %v622_v23  ;;  %1115 = vmatpush.msrb.mxu0 %v3846_v2  ;;  %v3852_v23 = vmax.f32 %v2930_v12, 0.0  ;;  %v2976_v2 = vadd.f32 %v2738_v41, %v2789_v18  ;;  %v433_v41 = vadd.f32 %v341_v13, %v2616_v24 }
 0x21b   :  { %1116 = vmatpush.msrb.mxu0 %v3847_v26 }
 0x21c   :  { %v2917_v35 = vpop.f32.mrf.mxu0 }
 0x21d   :  { %1117 = vmatpush.msrb.mxu0 %v3848_v20  ;;  %v2992_v20 = vadd.f32 %v2713_v10, %v2789_v18  ;;  %v498_v10 = vadd.f32 %v2511_v19, %v433_v41  ;;  %v310_v41 = vrot.slane %v2779_v21, 5 }
 0x21e   :  { %v2926_v31 = vpop.f32.mrf.mxu1 }
 0x21f   :  { %1118 = vmatpush.msrb.mxu0 %v3849_v42  ;;  %v3001_v42 = vadd.f32 %v2700_v63, %v2789_v18 }
 0x221   :  { %2170 = vmatmul.msk.f32.gmra.mxu1 %vm34_vm1, %v623_v48  ;;  %1119 = vmatpush.msrb.mxu0 %v3850_v47  ;;  %v2958_v48 = vadd.f32 %v2758_v60, %v2789_v18  ;;  %v624_v60 = vmul.f32 %v560_v11, %v2640_v52  ;;  %v561_v11 = vmax.f32 %v497_v36, 0.0  ;;  %v3858_v36 = vmax.f32 %v2984_v49, 0.0 }
 0x222   :  { %v3860_v63 = vmax.f32 %v3001_v42, 0.0 }
 0x223   :  { %1120 = vmatpush.msrb.mxu0 %v3851_v62  ;;  %v3855_v26 = vmax.f32 %v2958_v48, 0.0  ;;  %v625_v47 = vmul.f32 %v561_v11, %v2640_v52  ;;  %v3010_v62 = vadd.f32 %v2689_v56, %v2789_v18  ;;  %v434_v11 = vadd.f32 %v341_v13, %v2636_v50 }
 0x224   :  { %v2954_v5 = vpop.f32.mrf.mxu0 }
 0x225   :  { %1121 = vmatpush.msrb.mxu0 %v3852_v23  ;;  %v3859_v23 = vmax.f32 %v2992_v20, 0.0  ;;  %v3862_v56 = vmax.f32 %v3010_v62, 0.0 }
 0x226   :  { %v2963_v4 = vpop.f32.mrf.mxu1 }
 0x227   :  { %1122 = vmatpush.msrb.mxu0 %v3853_v9  ;;  %v562_v9 = vmax.f32 %v498_v10, 0.0  ;;  %v342_v10 = vperm.slane %v310_v41, 0 }
 0x229   :  { %2171 = vmatmul.msk.f32.gmra.mxu1 %vm34_vm1, %v624_v60  ;;  %1123 = vmatpush.msrb.mxu0 %v3854_v16  ;;  %v3857_v60 = vmax.f32 %v2976_v2, 0.0 }
 0x22b   :  { %1124 = vmatpush.msrb.mxu0 %v3855_v26  ;;  %v626_v26 = vmul.f32 %v562_v9, %v2640_v52 }
 0x22c   :  { %v902_v33 = vpop.f32.mrf.mxu0 }
 0x22d   :  { %1125 = vmatpush.msrb.mxu0 %v3856_v29  ;;  %v499_v29 = vadd.f32 %v2511_v19, %v434_v11  ;;  %v436_v11 = vadd.f32 %v342_v10, %v2636_v50 }
 0x22e   :  { %v2997_v28 = vpop.f32.mrf.mxu1 }
 0x22f   :  { %1126 = vmatpush.msrb.mxu0 %v3857_v60  ;;  %v563_v13 = vmax.f32 %v499_v29, 0.0  ;;  %v435_v60 = vadd.f32 %v342_v10, %v2616_v24  ;;  %v3054_v10 = vadd.f32 %v902_v33, %v2789_v18 }
 0x231   :  { %2172 = vmatmul.msk.f32.gmra.mxu1 %vm34_vm1, %v625_v47  ;;  %1127 = vmatpush.msrb.mxu0 %v3858_v36  ;;  %v500_v45 = vadd.f32 %v2511_v19, %v435_v60 }
 0x233   :  { %1128 = vmatpush.msrb.mxu0 %v3859_v23  ;;  %v564_v9 = vmax.f32 %v500_v45, 0.0  ;;  %v501_v45 = vadd.f32 %v2511_v19, %v436_v11  ;;  %v3070_v11 = vadd.f32 %v2917_v35, %v2789_v18 }
 0x234   :  { %v905_v16 = vpop.f32.mrf.mxu0 }
 0x235   :  { %1129 = vmatpush.msrb.mxu0 %v3860_v63  ;;  %v627_v63 = vmul.f32 %v563_v13, %v2640_v52  ;;  %v3048_v13 = vadd.f32 %v905_v16, %v2789_v18  ;;  %v3062_v16 = vadd.f32 %v2954_v5, %v2789_v18 }
 0x236   :  { %v3024_v47 = vpop.f32.mrf.mxu1 }
 0x237   :  { %1130 = vmatpush.msrb.mxu0 %v3862_v56  ;;  %v311_v56 = vrot.slane %v2779_v21, 6  ;;  %v3872_v5 = vmax.f32 %v3062_v16, 0.0  ;;  %v440_v21 = vadd.f32 %v344_v0, %v2636_v50 }
 0x239   :  { %2173 = vmatmul.msk.f32.gmra.mxu1 %vm34_vm1, %v626_v26  ;;  %v343_v54 = vperm.slane %v311_v56, 0  ;;  %v3867_v56 = vmax.f32 %v3048_v13, 0.0  ;;  %v505_v59 = vadd.f32 %v2511_v19, %v440_v21  ;;  %v3144_v21 = vadd.f32 %v3024_v47, %v2789_v18 }
 0x23a   :  { %v3160_v47 = vadd.f32 %v2963_v4, %v2789_v18 }
 0x23b   :  { %v437_v33 = vadd.f32 %v343_v54, %v2616_v24 }
 0x23c   :  { %v908_v36 = vpop.f32.mrf.mxu0  ;;  %v3884_v4 = vmax.f32 %v3160_v47, 0.0 }
 0x23d   :  { %v3040_v26 = vadd.f32 %v908_v36, %v2789_v18 }
 0x23e   :  { %v3032_v23 = vpop.f32.mrf.mxu1 }
 0x23f   :  { %v3866_v36 = vmax.f32 %v3040_v26, 0.0 }
 0x241   :  { %2174 = vmatmul.msk.f32.gmra.mxu1 %vm34_vm1, %v627_v63  ;;  %v628_v63 = vmul.f32 %v564_v9, %v2640_v52  ;;  %v565_v9 = vmax.f32 %v501_v45, 0.0  ;;  %v502_v45 = vadd.f32 %v2511_v19, %v437_v33 }
 0x243   :  { %v566_v35 = vmax.f32 %v502_v45, 0.0  ;;  %v504_v45 = vadd.f32 %v2511_v19, %v439_v1 }
 0x244   :  { %v911_v41 = vpop.f32.mrf.mxu0 }
 0x245   :  { %v3043_v29 = vadd.f32 %v911_v41, %v2789_v18  ;;  %v3869_v41 = vmax.f32 %v3054_v10, 0.0 }
 0x246   :  { %v3045_v30 = vpop.f32.mrf.mxu1 }
 0x247   :  { %v3865_v60 = vmax.f32 %v3043_v29, 0.0 }
 0x249   :  { %2175 = vmatmul.msk.f32.gmra.mxu1 %vm34_vm1, %v628_v63  ;;  %1145 = vmatpush.msra.mxu2 %v3865_v60  ;;  %v629_v60 = vmul.f32 %v565_v9, %v2640_v52  ;;  %v630_v9 = vmul.f32 %v566_v35, %v2640_v52 }
 0x24b   :  { %1146 = vmatpush.msra.mxu2 %v3866_v36  ;;  %v3874_v36 = vmax.f32 %v3070_v11, 0.0 }
 0x24d   :  { %1147 = vmatpush.msra.mxu2 %v3867_v56  ;;  %v438_v56 = vadd.f32 %v343_v54, %v2636_v50  ;;  %v568_v54 = vmax.f32 %v504_v45, 0.0  ;;  %v3130_v45 = vadd.f32 %v3045_v30, %v2789_v18 }
 0x24e   :  { %v977_v63 = vpop.f32.mrf.mxu1 }
 0x24f   :  { %1148 = vmatpush.msra.mxu2 %v3869_v41  ;;  %v503_v33 = vadd.f32 %v2511_v19, %v438_v56  ;;  %v632_v35 = vmul.f32 %v568_v54, %v2640_v52  ;;  %v569_v56 = vmax.f32 %v505_v59, 0.0  ;;  %v1104_v19 = vld [vmem:[%s3841_s5] sm:$0xff]  ;;  %v3880_v30 = vmax.f32 %v3130_v45, 0.0 }
 0x250   :  { %1106 = vst [vmem:[#allocation1] ss:$4 sm:$0xff] %v1104_v19  ;;  %v954_v19 = vadd.f32 %v2881_v40, %v2789_v18 }
 0x251   :  { %2176 = vmatmul.msk.f32.gmra.mxu1 %vm34_vm1, %v629_v60  ;;  %1149 = vmatpush.msra.mxu2 %v3872_v5  ;;  %v567_v60 = vmax.f32 %v503_v33, 0.0  ;;  %v633_v1 = vmul.f32 %v569_v56, %v2640_v52  ;;  %v3882_v56 = vmax.f32 %v3144_v21, 0.0 }
 0x252   :  { %v1075_v40 = vmax.f32 %v954_v19, 0.0  ;;  %v3898_v19 = vmax.f32 %v2823_v58, 0.0  ;;  %v3902_v58 = vmax.f32 %v2792_v38, 0.0 }
 0x253   :  { %1150 = vmatpush.msra.mxu2 %v3874_v36  ;;  %v631_v7 = vmul.f32 %v567_v60, %v2640_v52  ;;  %v3121_v52 = vadd.f32 %v977_v63, %v2789_v18  ;;  %v3137_v63 = vadd.f32 %v3032_v23, %v2789_v18 }
 0x255   :  { %v3879_v54 = vmax.f32 %v3121_v52, 0.0  ;;  %v3881_v23 = vmax.f32 %v3137_v63, 0.0 }
 0x256   :  { %v980_v41 = vpop.f32.mrf.mxu1 }
 0x257   :  { %v3115_v0 = vadd.f32 %v980_v41, %v2789_v18  ;;  %v1107_v38 = vld.sshfl [vmem:[#allocation1] sm:$0xff pattern:$0x73625140] }
 0x258   :  { %1131 = vmatmul.f32.vlgmr.msrb.gmra.mxu0 %v1107_v38 }
 0x259   :  { %2177 = vmatmul.msk.f32.gmra.mxu1 %vm34_vm1, %v630_v9  ;;  %v3878_v41 = vmax.f32 %v3115_v0, 0.0 }
 0x25e   :  { %v983_v5 = vpop.f32.mrf.mxu1 }
 0x261   :  { %2178 = vmatmul.msk.f32.gmra.mxu1 %vm34_vm1, %v631_v7  ;;  %v3107_v7 = vadd.f32 %v983_v5, %v2789_v18 }
 0x263   :  { %v3877_v5 = vmax.f32 %v3107_v7, 0.0 }
 0x266   :  { %v986_v36 = vpop.f32.mrf.mxu1 }
 0x267   :  { %v3100_v24 = vadd.f32 %v986_v36, %v2789_v18 }
 0x269   :  { %2179 = vmatmul.msk.f32.gmra.mxu1 %vm34_vm1, %v632_v35  ;;  %v3876_v36 = vmax.f32 %v3100_v24, 0.0  ;;  %v3151_v35 = vadd.f32 %v2997_v28, %v2789_v18  ;;  %v3167_v28 = vadd.f32 %v2926_v31, %v2789_v18 }
 0x26b   :  { %v3885_v31 = vmax.f32 %v3167_v28, 0.0 }
 0x26e   :  { %v989_v9 = vpop.f32.mrf.mxu1 }
 0x26f   :  { %v3103_v33 = vadd.f32 %v989_v9, %v2789_v18  ;;  %v3883_v9 = vmax.f32 %v3151_v35, 0.0 }
 0x271   :  { %v3875_v50 = vmax.f32 %v3103_v33, 0.0  ;;  %2180 = vmatmul.msk.f32.gmra.mxu1 %vm34_vm1, %v633_v1  ;;  %v3174_v1 = vadd.f32 %v2894_v44, %v2789_v18 }
 0x273   :  { %1155 = vmatpush.msrb.mxu3 %v3875_v50  ;;  %v1076_v44 = vmax.f32 %v3174_v1, 0.0  ;;  %v3200_v1 = vld [vmem:[%s3839_s3 + $0xb8] sm:$0xff] }
 0x275   :  { %1156 = vmatpush.msrb.mxu3 %v3876_v36  ;;  %v951_v36 = vadd.f32 %v2875_v22, %v2789_v18 }
 0x276   :  { %v3126_v60 = vpop.f32.mrf.mxu1 }
 0x277   :  { %1157 = vmatpush.msrb.mxu3 %v3877_v5  ;;  %v948_v5 = vadd.f32 %v2853_v34, %v2789_v18  ;;  %v3211_v34 = vld [vmem:[%s3839_s3 + $0xa8] sm:$0xff] }
 0x279   :  { %1158 = vmatpush.msrb.mxu3 %v3878_v41  ;;  %v945_v41 = vadd.f32 %v2820_v55, %v2789_v18  ;;  %v3205_v55 = vld [vmem:[%s3839_s3 + $0xb0] sm:$0xff] }
 0x27b   :  { %1159 = vmatpush.msrb.mxu3 %v3879_v54  ;;  %v1074_v54 = vmax.f32 %v951_v36, 0.0  ;;  %v1072_v22 = vmax.f32 %v945_v41, 0.0  ;;  %v3897_v41 = vmax.f32 %v2832_v27, 0.0  ;;  %v3901_v27 = vmax.f32 %v2800_v43, 0.0 }
 0x27c   :  { %v1108_v43 = vld.sshfl [vmem:[#allocation1 + $0x8] sm:$0xff pattern:$0x73625140] }
 0x27d   :  { %1160 = vmatpush.msrb.mxu3 %v3880_v30  ;;  %v1073_v30 = vmax.f32 %v948_v5, 0.0  ;;  %v3217_v5 = vld [vmem:[%s3839_s3 + $0xa0] sm:$0xff]  ;;  %1151 = vmatmul.f32.vlgmr.msra.gmra.mxu2 %v1108_v43 }
 0x27e   :  { %v3156_v59 = vpop.f32.mrf.mxu1 }
 0x27f   :  { %1161 = vmatpush.msrb.mxu3 %v3881_v23 }
 0x281   :  { %1162 = vmatpush.msrb.mxu3 %v3882_v56  ;;  %v1109_v56 = vld.sshfl [vmem:[#allocation1 + $0x10] sm:$0xff pattern:$0x73625140] }
 0x283   :  { %1163 = vmatpush.msrb.mxu3 %v3883_v9 }
 0x285   :  { %1164 = vmatpush.msrb.mxu3 %v3884_v4  ;;  %v3899_v4 = vmax.f32 %v2815_v51, 0.0  ;;  %v3903_v51 = vmax.f32 %v2795_v39, 0.0 }
 0x286   :  { %v3184_v50 = vpop.f32.mrf.mxu1 }
 0x287   :  { %1165 = vmatpush.msrb.mxu3 %v3885_v31 }
 0x289   :  { %1166 = vmatpush.msrb.mxu3 %v1076_v44 }
 0x28b   :  { %1167 = vmatpush.msrb.mxu3 %v1075_v40 }
 0x28d   :  { %1168 = vmatpush.msrb.mxu3 %v1074_v54 }
 0x28e   :  { %v3195_v23 = vpop.f32.mrf.mxu1 }
 0x28f   :  { %1169 = vmatpush.msrb.mxu3 %v1073_v30 }
 0x291   :  { %1170 = vmatpush.msrb.mxu3 %v1072_v22 }
 0x292   :  { %1171 = vmatmul.f32.vlgmr.msrb.gmra.mxu3 %v1109_v56 }
 0x293   :  { %2318 = vmatpush.msra.mxu3 %v3200_v1 }
 0x295   :  { %2319 = vmatpush.msra.mxu3 %v3205_v55 }
 0x296   :  { %v1004_v36 = vpop.f32.mrf.mxu1 }
 0x297   :  { %2320 = vmatpush.msra.mxu3 %v3211_v34 }
 0x299   :  { %2321 = vmatpush.msra.mxu3 %v3217_v5 }
 0x29a   :  { %2207 = vmatmul.msk.f32.vlgmr.msra.gmra.mxu3 %vm34_vm1, %v3897_v41 }
 0x29e   :  { %v1007_v56 = vpop.f32.mrf.mxu1 }
 0x2a2   :  { %2208 = vmatmul.msk.f32.gmra.mxu3 %vm34_vm1, %v3898_v19 }
 0x2a6   :  { %v1010_v9 = vpop.f32.mrf.mxu1 }
 0x2aa   :  { %2209 = vmatmul.msk.f32.gmra.mxu3 %vm34_vm1, %v3899_v4 }
 0x2ae   :  { %v1013_v31 = vpop.f32.mrf.mxu1 }
 0x2b2   :  { %2210 = vmatmul.msk.f32.gmra.mxu3 %vm34_vm1, %v3900_v53 }
 0x2b6   :  { %v1016_v6 = vpop.f32.mrf.mxu1 }
 0x2ba   :  { %2211 = vmatmul.msk.f32.gmra.mxu3 %vm34_vm1, %v3901_v27 }
 0x2be   :  { %v1019_v41 = vpop.f32.mrf.mxu1 }
 0x2c2   :  { %2212 = vmatmul.msk.f32.gmra.mxu3 %vm34_vm1, %v3902_v58 }
 0x2c6   :  { %v1022_v19 = vpop.f32.mrf.mxu1 }
 0x2ca   :  { %2213 = vmatmul.msk.f32.gmra.mxu3 %vm34_vm1, %v3903_v51 }
 0x2ce   :  { %v1025_v4 = vpop.f32.mrf.mxu1 }
 0x2cf   :  { %v3264_v43 = vadd.f32 %v1025_v4, %v2789_v18  ;;  %v3904_v4 = vmax.f32 %v3167_v28, 0.0  ;;  %v3297_v28 = vadd.f32 %v1010_v9, %v2789_v18  ;;  %v1005_v9 = vadd.f32 %v1004_v36, %v2789_v18 }
 0x2d1   :  { %v3892_v38 = vmax.f32 %v3264_v43, 0.0 }
 0x2d2   :  { %2214 = vmatmul.msk.f32.gmra.mxu3 %vm34_vm1, %v1072_v22 }
 0x2d6   :  { %v1028_v46 = vpop.f32.mrf.mxu1 }
 0x2da   :  { %2215 = vmatmul.msk.f32.gmra.mxu3 %vm34_vm1, %v1073_v30 }
 0x2de   :  { %v1031_v53 = vpop.f32.mrf.mxu1 }
 0x2df   :  { %v3253_v22 = vadd.f32 %v1031_v53, %v2789_v18  ;;  %v3270_v53 = vadd.f32 %v1022_v19, %v2789_v18  ;;  %v3285_v19 = vadd.f32 %v1016_v6, %v2789_v18  ;;  %v3303_v6 = vadd.f32 %v1007_v56, %v2789_v18 }
 0x2e0   :  { %v1002_v56 = vadd.f32 %v3195_v23, %v2789_v18  ;;  %v993_v23 = vadd.f32 %v3126_v60, %v2789_v18 }
 0x2e2   :  { %2216 = vmatmul.msk.f32.gmra.mxu3 %vm34_vm1, %v1074_v54  ;;  %v3258_v54 = vadd.f32 %v1028_v46, %v2789_v18  ;;  %v3276_v46 = vadd.f32 %v1019_v41, %v2789_v18  ;;  %v3291_v41 = vadd.f32 %v1013_v31, %v2789_v18  ;;  %v3905_v31 = vmax.f32 %v3160_v47, 0.0 }
 0x2e3   :  { %v996_v47 = vadd.f32 %v3156_v59, %v2789_v18  ;;  %v1091_v36 = vmax.f32 %v1002_v56, 0.0  ;;  %v3907_v59 = vmax.f32 %v3144_v21, 0.0 }
 0x2e6   :  { %v1034_v27 = vpop.f32.mrf.mxu1 }
 0x2e7   :  { %v3247_v39 = vadd.f32 %v1034_v27, %v2789_v18  ;;  %v3890_v27 = vmax.f32 %v3253_v22, 0.0 }
 0x2ea   :  { %2217 = vmatmul.msk.f32.gmra.mxu3 %vm34_vm1, %v1075_v40  ;;  %v3889_v40 = vmax.f32 %v3247_v39, 0.0 }
 0x2ee   :  { %v1037_v58 = vpop.f32.mrf.mxu1 }
 0x2ef   :  { %v3250_v51 = vadd.f32 %v1037_v58, %v2789_v18  ;;  %v3893_v58 = vmax.f32 %v3270_v53, 0.0 }
 0x2f1   :  { %v3888_v30 = vmax.f32 %v3250_v51, 0.0 }
 0x2f2   :  { %2218 = vmatmul.msk.f32.gmra.mxu3 %vm34_vm1, %v1076_v44  ;;  %v3891_v44 = vmax.f32 %v3258_v54, 0.0 }
 0x2f3   :  { %1175 = vmatpush.msra.mxu0 %v3888_v30  ;;  %v3894_v30 = vmax.f32 %v3276_v46, 0.0 }
 0x2f5   :  { %1176 = vmatpush.msra.mxu0 %v3889_v40  ;;  %v1095_v40 = vmax.f32 %v3291_v41, 0.0  ;;  %v3918_v41 = vmax.f32 %v3270_v53, 0.0 }
 0x2f7   :  { %1177 = vmatpush.msra.mxu0 %v3890_v27  ;;  %v1094_v27 = vmax.f32 %v3297_v28, 0.0  ;;  %v3906_v28 = vmax.f32 %v3151_v35, 0.0  ;;  %v3908_v35 = vmax.f32 %v3137_v63, 0.0 }
 0x2f9   :  { %1178 = vmatpush.msra.mxu0 %v3891_v44  ;;  %v1093_v44 = vmax.f32 %v3303_v6, 0.0  ;;  %v1089_v6 = vmax.f32 %v996_v47, 0.0  ;;  %v3911_v47 = vmax.f32 %v3115_v0, 0.0 }
 0x2fa   :  { %2219 = vmatmul.msk.f32.gmra.mxu3 %vm34_vm1, %v3904_v4  ;;  %v1096_v4 = vmax.f32 %v3285_v19, 0.0 }
 0x2fb   :  { %1179 = vmatpush.msra.mxu0 %v3892_v38  ;;  %v999_v38 = vadd.f32 %v3184_v50, %v2789_v18  ;;  %v1110_v50 = vld.sshfl [vmem:[#allocation1 + $0x18] sm:$0xff pattern:$0x73625140]  ;;  %v3909_v18 = vmax.f32 %v3130_v45, 0.0 }
 0x2fd   :  { %1180 = vmatpush.msra.mxu0 %v3893_v58  ;;  %v1092_v58 = vmax.f32 %v1005_v9, 0.0 }
 0x2ff   :  { %1181 = vmatpush.msra.mxu0 %v3894_v30  ;;  %v1088_v30 = vmax.f32 %v993_v23, 0.0  ;;  %v3913_v23 = vmax.f32 %v3100_v24, 0.0 }
 0x301   :  { %1182 = vmatpush.msra.mxu0 %v1096_v4 }
 0x302   :  { %2220 = vmatmul.msk.f32.gmra.mxu3 %vm34_vm1, %v3905_v31  ;;  %v1090_v31 = vmax.f32 %v999_v38, 0.0  ;;  %v3910_v38 = vmax.f32 %v3121_v52, 0.0 }
 0x303   :  { %1183 = vmatpush.msra.mxu0 %v1095_v40 }
 0x305   :  { %1184 = vmatpush.msra.mxu0 %v1094_v27 }
 0x307   :  { %1185 = vmatpush.msra.mxu0 %v1093_v44 }
 0x309   :  { %1186 = vmatpush.msra.mxu0 %v1092_v58 }
 0x30a   :  { %2221 = vmatmul.msk.f32.gmra.mxu3 %vm34_vm1, %v3906_v28  ;;  %v3912_v28 = vmax.f32 %v3107_v7, 0.0 }
 0x30b   :  { %1187 = vmatpush.msra.mxu0 %v1091_v36 }
 0x30d   :  { %1188 = vmatpush.msra.mxu0 %v1090_v31 }
 0x30f   :  { %1189 = vmatpush.msra.mxu0 %v1089_v6 }
 0x311   :  { %1190 = vmatpush.msra.mxu0 %v1088_v30 }
 0x312   :  { %1191 = vmatmul.f32.vlgmr.msra.gmra.mxu0 %v1110_v50  ;;  %2222 = vmatmul.msk.f32.gmra.mxu3 %vm34_vm1, %v3907_v59  ;;  %v3914_v50 = vmax.f32 %v3103_v33, 0.0  ;;  %v1198_v33 = vld [vmem:[%s3839_s3 + $0xd8] sm:$0xff] }
 0x313   :  { %1214 = vmatpush.msrb.mxu2 %v1198_v33  ;;  %v3923_v33 = vmax.f32 %v2976_v2, 0.0  ;;  %v3928_v2 = vmax.f32 %v3250_v51, 0.0  ;;  %v3932_v51 = vmax.f32 %v2921_v37, 0.0  ;;  %v3936_v37 = vmax.f32 %v2889_v61, 0.0 }
 0x315   :  { %v1172_v9 = vpop.f32.mrf.mxu3 }
 0x31a   :  { %2223 = vmatmul.msk.f32.gmra.mxu3 %vm34_vm1, %v3908_v35 }
 0x31d   :  { %v3333_v56 = vpop.f32.mrf.mxu3 }
 0x322   :  { %2224 = vmatmul.msk.f32.gmra.mxu3 %vm34_vm1, %v3909_v18 }
 0x325   :  { %v3338_v60 = vpop.f32.mrf.mxu3 }
 0x32a   :  { %2225 = vmatmul.msk.f32.gmra.mxu3 %vm34_vm1, %v3910_v38 }
 0x32d   :  { %v3343_v21 = vpop.f32.mrf.mxu3 }
 0x332   :  { %2226 = vmatmul.msk.f32.gmra.mxu3 %vm34_vm1, %v3911_v47  ;;  %v1132_v47 = vpop.f32.mrf.mxu0 }
 0x335   :  { %v3348_v63 = vpop.f32.mrf.mxu3 }
 0x33a   :  { %2227 = vmatmul.msk.f32.gmra.mxu3 %vm34_vm1, %v3912_v28  ;;  %v1152_v28 = vpop.f32.mrf.mxu2 }
 0x33d   :  { %v3353_v45 = vpop.f32.mrf.mxu3 }
 0x342   :  { %2228 = vmatmul.msk.f32.gmra.mxu3 %vm34_vm1, %v3913_v23 }
 0x345   :  { %v3358_v52 = vpop.f32.mrf.mxu3 }
 0x34a   :  { %2229 = vmatmul.msk.f32.gmra.mxu3 %vm34_vm1, %v3914_v50 }
 0x34d   :  { %v3363_v0 = vpop.f32.mrf.mxu3 }
 0x352   :  { %2230 = vmatmul.msk.f32.gmra.mxu3 %vm34_vm1, %v1088_v30  ;;  %v1197_v30 = vld [vmem:[%s3839_s3 + $0xd0] sm:$0xff] }
 0x353   :  { %1215 = vmatpush.msrb.mxu2 %v1197_v30  ;;  %v3925_v30 = vmax.f32 %v2967_v14, 0.0 }
 0x355   :  { %v3366_v59 = vpop.f32.mrf.mxu3 }
 0x35a   :  { %2231 = vmatmul.msk.f32.gmra.mxu3 %vm34_vm1, %v1089_v6 }
 0x35d   :  { %v3369_v7 = vpop.f32.mrf.mxu3 }
 0x362   :  { %2232 = vmatmul.msk.f32.gmra.mxu3 %vm34_vm1, %v1090_v31  ;;  %v1196_v31 = vld [vmem:[%s3839_s3 + $0xc8] sm:$0xff] }
 0x363   :  { %1216 = vmatpush.msrb.mxu2 %v1196_v31  ;;  %v3927_v31 = vmax.f32 %v2958_v48, 0.0 }
 0x365   :  { %v3372_v24 = vpop.f32.mrf.mxu3 }
 0x36a   :  { %2233 = vmatmul.msk.f32.gmra.mxu3 %vm34_vm1, %v1091_v36  ;;  %v1195_v36 = vld [vmem:[%s3839_s3 + $0xc0] sm:$0xff] }
 0x36b   :  { %1217 = vmatpush.msrb.mxu2 %v1195_v36  ;;  %v3929_v36 = vmax.f32 %v2948_v17, 0.0  ;;  %v3933_v17 = vmax.f32 %v2911_v32, 0.0  ;;  %v3474_v32 = vld [vmem:[%s3840_s4] sm:$0xff]  ;;  %s2359_s4 = smov [#allocation2]  }
 0x36c   :  { %s2092_s21 = sshll.u32 %s2359_s4, 4  ;;  %s2093_s21 = int_to_ptr.vmem [resolvable:$true] %s2092_s21 }
 0x36d   :  { %v3381_v35 = vpop.f32.mrf.mxu3  ;;  %1431 = vmatpush.msra.mxu2 %v3200_v1 }
 0x36f   :  { %1432 = vmatpush.msra.mxu2 %v3205_v55 }
 0x371   :  { %1433 = vmatpush.msra.mxu2 %v3211_v34 }
 0x372   :  { %2234 = vmatmul.msk.f32.gmra.mxu3 %vm34_vm1, %v1092_v58  ;;  %v1153_v58 = vadd.f32 %v1152_v28, %v1132_v47  ;;  %v3930_v47 = vmax.f32 %v2939_v57, 0.0  ;;  %v3931_v28 = vmax.f32 %v2930_v12, 0.0  ;;  %v3934_v57 = vmax.f32 %v2903_v25, 0.0 }
 0x373   :  { %1434 = vmatpush.msra.mxu2 %v3217_v5  ;;  %v3915_v5 = vmax.f32 %v3010_v62, 0.0  ;;  %v3920_v62 = vmax.f32 %v3264_v43, 0.0  ;;  %v3935_v12 = vmax.f32 %v2898_v15, 0.0  ;;  %v3477_v25 = vperm.slane %v3474_v32, 4 }
 0x374   :  { %v1173_v23 = vadd.f32 %v1172_v9, %v1153_v58  ;;  %v3921_v9 = vmax.f32 %v2984_v49, 0.0  ;;  %v3926_v49 = vmax.f32 %v3247_v39, 0.0 }
 0x375   :  { %v3391_v6 = vpop.f32.mrf.mxu3  ;;  %v1530_v15 = vadd.f32 %v3363_v0, %v3477_v25  ;;  %v1533_v61 = vadd.f32 %v3366_v59, %v3477_v25 }
 0x37a   :  { %2235 = vmatmul.msk.f32.gmra.mxu3 %vm34_vm1, %v1093_v44  ;;  %v3917_v44 = vmax.f32 %v3001_v42, 0.0  ;;  %v3922_v42 = vmax.f32 %v3258_v54, 0.0 }
 0x37d   :  { %v1547_v18 = vpop.f32.mrf.mxu3 }
 0x37e   :  { %v1548_v0 = vadd.f32 %v1547_v18, %v3477_v25 }
 0x382   :  { %2236 = vmatmul.msk.f32.gmra.mxu3 %vm34_vm1, %v1094_v27  ;;  %v3916_v27 = vmax.f32 %v3276_v46, 0.0 }
 0x385   :  { %v1550_v38 = vpop.f32.mrf.mxu3 }
 0x386   :  { %v1551_v59 = vadd.f32 %v1550_v38, %v3477_v25 }
 0x38a   :  { %2237 = vmatmul.msk.f32.gmra.mxu3 %vm34_vm1, %v1095_v40 }
 0x38d   :  { %v1553_v1 = vpop.f32.mrf.mxu3 }
 0x38f   :  { %v1192_v55 = vpop.f32.mrf.mxu0 }
 0x390   :  { %v1193_v50 = vadd.f32 %v1192_v55, %v1173_v23 }
 0x392   :  { %2181 = vmatmul.msk.f32.vlgmr.msrb.gmra.mxu2 %vm34_vm1, %v1193_v50  ;;  %2238 = vmatmul.msk.f32.gmra.mxu3 %vm34_vm1, %v1096_v4  ;;  %v3919_v4 = vmax.f32 %v2992_v20, 0.0  ;;  %v3924_v20 = vmax.f32 %v3253_v22, 0.0 }
 0x395   :  { %v1556_v34 = vpop.f32.mrf.mxu3 }
 0x39a   :  { %2182 = vmatmul.msk.f32.vlgmr.msra.gmra.mxu2 %vm34_vm1, %v3915_v5  ;;  %2239 = vmatmul.msk.f32.gmra.mxu3 %vm34_vm1, %v3916_v27  ;;  %v1527_v27 = vadd.f32 %v3358_v52, %v3477_v25  ;;  %v1545_v52 = vadd.f32 %v3391_v6, %v3477_v25 }
 0x39d   :  { %v1559_v40 = vpop.f32.mrf.mxu3 }
 0x3a2   :  { %2183 = vmatmul.msk.f32.gmra.mxu2 %vm34_vm1, %v3917_v44  ;;  %2240 = vmatmul.msk.f32.gmra.mxu3 %vm34_vm1, %v3918_v41  ;;  %v3937_v44 = vmax.f32 %v2892_v3, 0.0  ;;  %v1536_v41 = vadd.f32 %v3369_v7, %v3477_v25  ;;  %v1554_v3 = vadd.f32 %v1553_v1, %v3477_v25 }
 0x3a5   :  { %v1562_v19 = vpop.f32.mrf.mxu3 }
 0x3a6   :  { %v1563_v7 = vadd.f32 %v1562_v19, %v3477_v25 }
 0x3aa   :  { %2184 = vmatmul.msk.f32.gmra.mxu2 %vm34_vm1, %v3919_v4  ;;  %2241 = vmatmul.msk.f32.gmra.mxu3 %vm34_vm1, %v3920_v62  ;;  %v1539_v4 = vadd.f32 %v3372_v24, %v3477_v25  ;;  %v1542_v62 = vadd.f32 %v3381_v35, %v3477_v25 }
 0x3ad   :  { %v1565_v46 = vpop.f32.mrf.mxu3 }
 0x3ae   :  { %v1566_v24 = vadd.f32 %v1565_v46, %v3477_v25 }
 0x3b2   :  { %2185 = vmatmul.msk.f32.gmra.mxu2 %vm34_vm1, %v3921_v9  ;;  %2242 = vmatmul.msk.f32.gmra.mxu3 %vm34_vm1, %v3922_v42  ;;  %v1557_v9 = vadd.f32 %v1556_v34, %v3477_v25  ;;  %v1560_v42 = vadd.f32 %v1559_v40, %v3477_v25 }
 0x3b5   :  { %v1568_v53 = vpop.f32.mrf.mxu3 }
 0x3ba   :  { %2186 = vmatmul.msk.f32.gmra.mxu2 %vm34_vm1, %v3923_v33  ;;  %2243 = vmatmul.msk.f32.gmra.mxu3 %vm34_vm1, %v3924_v20  ;;  %v1569_v33 = vadd.f32 %v1568_v53, %v3477_v25 }
 0x3bd   :  { %v1571_v43 = vpop.f32.mrf.mxu3 }
 0x3be   :  { %v1572_v20 = vadd.f32 %v1571_v43, %v3477_v25 }
 0x3c2   :  { %2187 = vmatmul.msk.f32.gmra.mxu2 %vm34_vm1, %v3925_v30  ;;  %2244 = vmatmul.msk.f32.gmra.mxu3 %vm34_vm1, %v3926_v49 }
 0x3c5   :  { %v1574_v54 = vpop.f32.mrf.mxu3 }
 0x3c6   :  { %v1575_v6 = vadd.f32 %v1574_v54, %v3477_v25 }
 0x3ca   :  { %2188 = vmatmul.msk.f32.gmra.mxu2 %vm34_vm1, %v3927_v31  ;;  %2245 = vmatmul.msk.f32.gmra.mxu3 %vm34_vm1, %v3928_v2 }
 0x3cd   :  { %v1577_v22 = vpop.f32.mrf.mxu3 }
 0x3ce   :  { %v1578_v1 = vadd.f32 %v1577_v22, %v3477_v25 }
 0x3d2   :  { %2189 = vmatmul.msk.f32.gmra.mxu2 %vm34_vm1, %v3929_v36 }
 0x3d5   :  { %v1580_v14 = vpop.f32.mrf.mxu3 }
 0x3d6   :  { %v1581_v34 = vadd.f32 %v1580_v14, %v3477_v25 }
 0x3da   :  { %2190 = vmatmul.msk.f32.gmra.mxu2 %vm34_vm1, %v3930_v47 }
 0x3dd   :  { %v1583_v39 = vpop.f32.mrf.mxu3 }
 0x3de   :  { %v1584_v40 = vadd.f32 %v1583_v39, %v3477_v25 }
 0x3e2   :  { %2191 = vmatmul.msk.f32.gmra.mxu2 %vm34_vm1, %v3931_v28  ;;  %v3938_v28 = vmax.f32 %v3070_v11, 0.0 }
 0x3e5   :  { %v1586_v48 = vpop.f32.mrf.mxu3 }
 0x3e6   :  { %v1587_v19 = vadd.f32 %v1586_v48, %v3477_v25 }
 0x3ea   :  { %2192 = vmatmul.msk.f32.gmra.mxu2 %vm34_vm1, %v3932_v51 }
 0x3ed   :  { %v1589_v58 = vpop.f32.mrf.mxu3 }
 0x3ee   :  { %v1590_v46 = vadd.f32 %v1589_v58, %v3477_v25 }
 0x3f2   :  { %2193 = vmatmul.msk.f32.gmra.mxu2 %vm34_vm1, %v3933_v17 }
 0x3f5   :  { %v1592_v23 = vpop.f32.mrf.mxu3 }
 0x3f6   :  { %v1593_v53 = vadd.f32 %v1592_v23, %v3477_v25 }
 0x3fa   :  { %2194 = vmatmul.msk.f32.gmra.mxu2 %vm34_vm1, %v3934_v57 }
 0x3fd   :  { %v1595_v55 = vpop.f32.mrf.mxu3 }
 0x3fe   :  { %v1596_v43 = vadd.f32 %v1595_v55, %v3477_v25 }
 0x402   :  { %2195 = vmatmul.msk.f32.gmra.mxu2 %vm34_vm1, %v3935_v12 }
 0x405   :  { %v1598_v50 = vpop.f32.mrf.mxu3 }
 0x406   :  { %v1599_v54 = vadd.f32 %v1598_v50, %v3477_v25 }
 0x40a   :  { %2196 = vmatmul.msk.f32.gmra.mxu2 %vm34_vm1, %v3936_v37 }
 0x40d   :  { %v1601_v5 = vpop.f32.mrf.mxu3 }
 0x40e   :  { %v1602_v31 = vadd.f32 %v1601_v5, %v3477_v25 }
 0x412   :  { %2197 = vmatmul.msk.f32.gmra.mxu2 %vm34_vm1, %v3937_v44 }
 0x415   :  { %v1219_v35 = vpop.f32.mrf.mxu2  ;;  %v1604_v38 = vpop.f32.mrf.mxu3 }
 0x416   :  { %v1629_v18 = vrot.slane %v1219_v35, 1  ;;  %v3506_v30 = vperm.slane %v1219_v35, 0  ;;  %v1605_v22 = vadd.f32 %v1604_v38, %v3477_v25 }
 0x418   :  { %v3515_v49 = vperm.slane %v1629_v18, 0  ;;  %v1665_v2 = vadd.f32 %v3506_v30, %v1530_v15  ;;  %v1521_v18 = vadd.f32 %v3348_v63, %v3477_v25 }
 0x41a   :  { %v3522_v36 = vadd.f32 %v3515_v49, %v1533_v61  ;;  %v3525_v14 = vadd.f32 %v3515_v49, %v1536_v41  ;;  %v3528_v47 = vadd.f32 %v3515_v49, %v1539_v4  ;;  %v3531_v39 = vadd.f32 %v3515_v49, %v1542_v62  ;;  %2198 = vmatmul.msk.f32.gmra.mxu2 %vm34_vm1, %v3938_v28 }
 0x41b   :  { %v3537_v48 = vadd.f32 %v3515_v49, %v1545_v52  ;;  %v3540_v51 = vadd.f32 %v3515_v49, %v1548_v0  ;;  %v3543_v58 = vadd.f32 %v3515_v49, %v1551_v59  ;;  %v3546_v17 = vadd.f32 %v3515_v49, %v1554_v3 }
 0x41c   :  { %v3549_v23 = vadd.f32 %v3515_v49, %v1557_v9  ;;  %v3552_v57 = vadd.f32 %v3515_v49, %v1560_v42  ;;  %v3555_v11 = vadd.f32 %v3515_v49, %v1563_v7  ;;  %v3558_v55 = vadd.f32 %v3515_v49, %v1566_v24 }
 0x41d   :  { %v3561_v12 = vadd.f32 %v3515_v49, %v1569_v33  ;;  %v3564_v50 = vadd.f32 %v3515_v49, %v1572_v20  ;;  %v3567_v37 = vadd.f32 %v3515_v49, %v1575_v6  ;;  %v3570_v5 = vadd.f32 %v3515_v49, %v1578_v1  ;;  %v3572_v15 = vpop.f32.mrf.mxu2  ;;  %v1607_v20 = vpop.f32.mrf.mxu3 }
 0x41e   :  { %v3575_v61 = vadd.f32 %v3515_v49, %v1581_v34  ;;  %v3578_v44 = vadd.f32 %v3515_v49, %v1584_v40  ;;  %v3581_v41 = vadd.f32 %v3515_v49, %v1587_v19  ;;  %v3584_v4 = vadd.f32 %v3515_v49, %v1590_v46 }
 0x41f   :  { %v3587_v62 = vadd.f32 %v3515_v49, %v1593_v53  ;;  %v3590_v52 = vadd.f32 %v3515_v49, %v1596_v43  ;;  %v3593_v0 = vadd.f32 %v3515_v49, %v1599_v54  ;;  %v3596_v59 = vadd.f32 %v3515_v49, %v1602_v31 }
 0x420   :  { %v3599_v3 = vadd.f32 %v3515_v49, %v1605_v22  ;;  %v1664_v9 = vadd.f32 %v3506_v30, %v1527_v27  ;;  %v1729_v42 = vmax.f32 %v1665_v2, 0.0  ;;  %v3939_v7 = vmax.f32 %v3062_v16, 0.0 }
 0x421   :  { %v1524_v24 = vadd.f32 %v3353_v45, %v3477_v25  ;;  %v1608_v16 = vadd.f32 %v1607_v20, %v3477_v25  ;;  %v1662_v27 = vadd.f32 %v3506_v30, %v1521_v18  ;;  %v3940_v1 = vmax.f32 %v3054_v10, 0.0 }
 0x422   :  { %2199 = vmatmul.msk.f32.gmra.mxu2 %vm34_vm1, %v3939_v7  ;;  %2263 = vmatpush.xpose.msk.msrb.mxu0 %vm34_vm1, %v1729_v42  ;;  %v1728_v35 = vmax.f32 %v1664_v9, 0.0  ;;  %v1518_v34 = vadd.f32 %v3343_v21, %v3477_v25  ;;  %v1515_v46 = vadd.f32 %v3338_v60, %v3477_v25  ;;  %v3941_v43 = vmax.f32 %v3048_v13, 0.0  ;;  %v3945_v7 = vld [vmem:[#allocation6_spill] sm:$0xff] }
 0x423   :  { %v1663_v33 = vadd.f32 %v3506_v30, %v1524_v24  ;;  %v3617_v45 = vadd.f32 %v3515_v49, %v1608_v16  ;;  %v1726_v40 = vmax.f32 %v1662_v27, 0.0  ;;  %v1512_v21 = vadd.f32 %v3333_v56, %v3477_v25 }
 0x424   :  { %v1661_v63 = vadd.f32 %v3506_v30, %v1518_v34  ;;  %v1660_v53 = vadd.f32 %v3506_v30, %v1515_v46  ;;  %v3942_v22 = vmax.f32 %v3040_v26, 0.0  ;;  %v3943_v28 = vmax.f32 %v3043_v29, 0.0 }
 0x425   :  { %v3609_v6 = vpop.f32.mrf.mxu2  ;;  %v1727_v38 = vmax.f32 %v1663_v33, 0.0  ;;  %v1659_v54 = vadd.f32 %v3506_v30, %v1512_v21  ;;  %v3944_v9 = vmax.f32 %v2857_v8, 0.0  ;;  %v3946_v24 = vmax.f32 %v3945_v7, 0.0  ;;  %v3947_v33 = vld [vmem:[#allocation5_spill] sm:$0xff] }
 0x426   :  { %2264 = vmatpush.xpose.msk.msrb.mxu0 %vm34_vm1, %v1728_v35  ;;  %v1725_v10 = vmax.f32 %v1661_v63, 0.0  ;;  %v1724_v31 = vmax.f32 %v1660_v53, 0.0  ;;  %v3948_v35 = vmax.f32 %v3947_v33, 0.0 }
 0x427   :  { %v1723_v60 = vmax.f32 %v1659_v54, 0.0 }
 0x42a   :  { %2200 = vmatmul.msk.f32.gmra.mxu2 %vm34_vm1, %v3940_v1  ;;  %2265 = vmatpush.xpose.msk.msrb.mxu0 %vm34_vm1, %v1727_v38 }
 0x42d   :  { %v3626_v19 = vpop.f32.mrf.mxu2 }
 0x42e   :  { %2266 = vmatpush.xpose.msk.msrb.mxu0 %vm34_vm1, %v1726_v40 }
 0x432   :  { %2201 = vmatmul.msk.f32.gmra.mxu2 %vm34_vm1, %v3941_v43  ;;  %2267 = vmatpush.xpose.msk.msrb.mxu0 %vm34_vm1, %v1725_v10 }
 0x435   :  { %v3639_v2 = vpop.f32.mrf.mxu2 }
 0x436   :  { %2268 = vmatpush.xpose.msk.msrb.mxu0 %vm34_vm1, %v1724_v31 }
 0x43a   :  { %2202 = vmatmul.msk.f32.gmra.mxu2 %vm34_vm1, %v3942_v22  ;;  %2269 = vmatpush.xpose.msk.msrb.mxu0 %vm34_vm1, %v1723_v60 }
 0x43d   :  { %v1448_v13 = vpop.f32.mrf.mxu2 }
 0x442   :  { %2203 = vmatmul.msk.f32.gmra.mxu2 %vm34_vm1, %v3943_v28 }
 0x445   :  { %v1451_v56 = vpop.f32.mrf.mxu2 }
 0x44a   :  { %2204 = vmatmul.msk.f32.gmra.mxu2 %vm34_vm1, %v3944_v9 }
 0x44d   :  { %v1454_v42 = vpop.f32.mrf.mxu2 }
 0x452   :  { %2205 = vmatmul.msk.f32.gmra.mxu2 %vm34_vm1, %v3946_v24 }
 0x455   :  { %v1457_v26 = vpop.f32.mrf.mxu2 }
 0x45a   :  { %2206 = vmatmul.msk.f32.gmra.mxu2 %vm34_vm1, %v3948_v35 }
 0x45d   :  { %v1460_v20 = vpop.f32.mrf.mxu2 }
 0x465   :  { %v1463_v18 = vpop.f32.mrf.mxu2 }
 0x466   :  { %v1464_v35 = vadd.f32 %v1463_v18, %v3477_v25 }
 0x46d   :  { %v1466_v29 = vpop.f32.mrf.mxu2 }
 0x46e   :  { %v1467_v7 = vadd.f32 %v1466_v29, %v3477_v25  ;;  %v1458_v29 = vadd.f32 %v1457_v26, %v3477_v25 }
 0x475   :  { %v1469_v16 = vpop.f32.mrf.mxu2 }
 0x476   :  { %v1470_v60 = vadd.f32 %v1469_v16, %v3477_v25 }
 0x478   :  { %v1645_v24 = vadd.f32 %v3506_v30, %v1470_v60 }
 0x47d   :  { %v1472_v27 = vpop.f32.mrf.mxu2 }
 0x47e   :  { %v1473_v21 = vadd.f32 %v1472_v27, %v3477_v25  ;;  %v1644_v27 = vadd.f32 %v3506_v30, %v1467_v7 }
 0x480   :  { %v1646_v22 = vadd.f32 %v3506_v30, %v1473_v21 }
 0x482   :  { %v1710_v33 = vmax.f32 %v1646_v22, 0.0 }
 0x485   :  { %v1475_v38 = vpop.f32.mrf.mxu2 }
 0x486   :  { %v1476_v46 = vadd.f32 %v1475_v38, %v3477_v25  ;;  %v1709_v38 = vmax.f32 %v1645_v24, 0.0  ;;  %v3703_v24 = vpop.f32.mrf.mxu3 }
 0x488   :  { %v1647_v54 = vadd.f32 %v3506_v30, %v1476_v46  ;;  %v1455_v46 = vadd.f32 %v1454_v42, %v3477_v25  ;;  %v1446_v42 = vadd.f32 %v3639_v2, %v3477_v25 }
 0x48a   :  { %v1711_v28 = vmax.f32 %v1647_v54, 0.0  ;;  %v1640_v21 = vadd.f32 %v3506_v30, %v1455_v46 }
 0x48c   :  { %v1704_v22 = vmax.f32 %v1640_v21, 0.0 }
 0x48d   :  { %v1478_v1 = vpop.f32.mrf.mxu2 }
 0x48e   :  { %v1479_v34 = vadd.f32 %v1478_v1, %v3477_v25  ;;  %v1461_v1 = vadd.f32 %v1460_v20, %v3477_v25  ;;  %v1452_v20 = vadd.f32 %v1451_v56, %v3477_v25 }
 0x490   :  { %v1648_v53 = vadd.f32 %v3506_v30, %v1479_v34  ;;  %v1708_v34 = vmax.f32 %v1644_v27, 0.0  ;;  %v1639_v60 = vadd.f32 %v3506_v30, %v1452_v20  ;;  %v1440_v27 = vadd.f32 %v3609_v6, %v3477_v25 }
 0x492   :  { %v1712_v31 = vmax.f32 %v1648_v53, 0.0  ;;  %v1641_v53 = vadd.f32 %v3506_v30, %v1458_v29  ;;  %v1703_v7 = vmax.f32 %v1639_v60, 0.0  ;;  %v3716_v29 = vpop.f32.mrf.mxu3 }
 0x494   :  { %v1705_v54 = vmax.f32 %v1641_v53, 0.0  ;;  %v1745_v53 = vmax.f32 %v3570_v5, 0.0 }
 0x495   :  { %v1481_v8 = vpop.f32.mrf.mxu2 }
 0x496   :  { %v1482_v63 = vadd.f32 %v1481_v8, %v3477_v25  ;;  %v1643_v8 = vadd.f32 %v3506_v30, %v1464_v35 }
 0x498   :  { %v1649_v40 = vadd.f32 %v3506_v30, %v1482_v63  ;;  %v1642_v63 = vadd.f32 %v3506_v30, %v1461_v1 }
 0x49a   :  { %v1713_v10 = vmax.f32 %v1649_v40, 0.0  ;;  %v1707_v40 = vmax.f32 %v1643_v8, 0.0  ;;  %v1437_v8 = vadd.f32 %v3572_v15, %v3477_v25  ;;  %v3724_v15 = vpop.f32.mrf.mxu3 }
 0x49c   :  { %2246 = vmatpush.xpose.msk.msrb.mxu2 %vm34_vm1, %v1713_v10  ;;  %v1706_v10 = vmax.f32 %v1642_v63, 0.0  ;;  %v1634_v63 = vadd.f32 %v3506_v30, %v1437_v8  ;;  %v1739_v8 = vmax.f32 %v3552_v57, 0.0 }
 0x49d   :  { %v3664_v43 = vpop.f32.mrf.mxu2 }
 0x49e   :  { %v1698_v46 = vmax.f32 %v1634_v63, 0.0 }
 0x4a0   :  { %2247 = vmatpush.xpose.msk.msrb.mxu2 %vm34_vm1, %v1712_v31  ;;  %v1449_v31 = vadd.f32 %v1448_v13, %v3477_v25  ;;  %v1637_v13 = vadd.f32 %v3506_v30, %v1446_v42 }
 0x4a4   :  { %2248 = vmatpush.xpose.msk.msrb.mxu2 %vm34_vm1, %v1711_v28  ;;  %v1638_v28 = vadd.f32 %v3506_v30, %v1449_v31  ;;  %v1743_v31 = vmax.f32 %v3564_v50, 0.0 }
 0x4a5   :  { %v3672_v9 = vpop.f32.mrf.mxu2 }
 0x4a6   :  { %v1702_v35 = vmax.f32 %v1638_v28, 0.0  ;;  %v1619_v28 = vpop.f32.mrf.mxu3 }
 0x4a8   :  { %2249 = vmatpush.xpose.msk.msrb.mxu2 %vm34_vm1, %v1710_v33  ;;  %v1443_v33 = vadd.f32 %v3626_v19, %v3477_v25 }
 0x4aa   :  { %v1636_v2 = vadd.f32 %v3506_v30, %v1443_v33 }
 0x4ac   :  { %2250 = vmatpush.xpose.msk.msrb.mxu2 %vm34_vm1, %v1709_v38  ;;  %v1701_v38 = vmax.f32 %v1637_v13, 0.0  ;;  %v1700_v19 = vmax.f32 %v1636_v2, 0.0  ;;  %v1741_v13 = vmax.f32 %v3558_v55, 0.0  ;;  %v1740_v2 = vmax.f32 %v3555_v11, 0.0 }
 0x4ad   :  { %v3680_v16 = vpop.f32.mrf.mxu2 }
 0x4ae   :  { %v1491_v11 = vadd.f32 %v3680_v16, %v3477_v25 }
 0x4b0   :  { %2251 = vmatpush.xpose.msk.msrb.mxu2 %vm34_vm1, %v1708_v34  ;;  %v1635_v34 = vadd.f32 %v3506_v30, %v1440_v27  ;;  %v1652_v57 = vadd.f32 %v3506_v30, %v1491_v11 }
 0x4b4   :  { %2252 = vmatpush.xpose.msk.msrb.mxu2 %vm34_vm1, %v1707_v40  ;;  %v1699_v40 = vmax.f32 %v1635_v34, 0.0 }
 0x4b5   :  { %v3688_v18 = vpop.f32.mrf.mxu2 }
 0x4b8   :  { %2253 = vmatpush.xpose.msk.msrb.mxu2 %vm34_vm1, %v1706_v10  ;;  %v1744_v10 = vmax.f32 %v3567_v37, 0.0  ;;  %v1742_v37 = vmax.f32 %v3561_v12, 0.0 }
 0x4bc   :  { %2254 = vmatpush.xpose.msk.msrb.mxu2 %vm34_vm1, %v1705_v54 }
 0x4bd   :  { %v1496_v26 = vpop.f32.mrf.mxu2 }
 0x4c0   :  { %2255 = vmatpush.xpose.msk.msrb.mxu2 %vm34_vm1, %v1704_v22 }
 0x4c4   :  { %2256 = vmatpush.xpose.msk.msrb.mxu2 %vm34_vm1, %v1703_v7 }
 0x4c5   :  { %v1499_v56 = vpop.f32.mrf.mxu2 }
 0x4c6   :  { %v1500_v7 = vadd.f32 %v1499_v56, %v3477_v25  ;;  %v1622_v56 = vpop.f32.mrf.mxu3 }
 0x4c8   :  { %2257 = vmatpush.xpose.msk.msrb.mxu2 %vm34_vm1, %v1702_v35  ;;  %v1497_v35 = vadd.f32 %v1496_v26, %v3477_v25  ;;  %v1655_v12 = vadd.f32 %v3506_v30, %v1500_v7 }
 0x4ca   :  { %v1654_v55 = vadd.f32 %v3506_v30, %v1497_v35  ;;  %v1752_v35 = vmax.f32 %v3593_v0, 0.0  ;;  %v1747_v0 = vmax.f32 %v3578_v44, 0.0 }
 0x4cc   :  { %2258 = vmatpush.xpose.msk.msrb.mxu2 %vm34_vm1, %v1701_v38  ;;  %v1494_v38 = vadd.f32 %v3688_v18, %v3477_v25  ;;  %v1718_v34 = vmax.f32 %v1654_v55, 0.0  ;;  %v1488_v18 = vadd.f32 %v3672_v9, %v3477_v25 }
 0x4cd   :  { %v1502_v1 = vpop.f32.mrf.mxu2 }
 0x4ce   :  { %v1503_v5 = vadd.f32 %v1502_v1, %v3477_v25  ;;  %v1719_v1 = vmax.f32 %v1655_v12, 0.0  ;;  %v1653_v26 = vadd.f32 %v3506_v30, %v1494_v38  ;;  %v1651_v16 = vadd.f32 %v3506_v30, %v1488_v18  ;;  %v1765_v38 = vpop.permute.xlu2 %1764 }
 0x4d0   :  { %2259 = vmatpush.xpose.msk.msrb.mxu2 %vm34_vm1, %v1700_v19  ;;  %v1656_v50 = vadd.f32 %v3506_v30, %v1503_v5  ;;  %v1738_v19 = vmax.f32 %v3549_v23, 0.0  ;;  %v1717_v63 = vmax.f32 %v1653_v26, 0.0  ;;  %v1485_v23 = vadd.f32 %v3664_v43, %v3477_v25 }
 0x4d2   :  { %v1720_v27 = vmax.f32 %v1656_v50, 0.0 }
 0x4d4   :  { %2260 = vmatpush.xpose.msk.msrb.mxu2 %vm34_vm1, %v1699_v40  ;;  %v1737_v40 = vmax.f32 %v3546_v17, 0.0  ;;  %v1650_v17 = vadd.f32 %v3506_v30, %v1485_v23 }
 0x4d5   :  { %v1505_v6 = vpop.f32.mrf.mxu2 }
 0x4d6   :  { %v1506_v21 = vadd.f32 %v1505_v6, %v3477_v25  ;;  %v1625_v6 = vpop.f32.mrf.mxu3 }
 0x4d7   :  { %v1626_v9 = vadd.f32 %v1625_v6, %v3477_v25 }
 0x4d8   :  { %2261 = vmatpush.xpose.msk.msrb.mxu2 %vm34_vm1, %v1698_v46  ;;  %v1657_v22 = vadd.f32 %v3506_v30, %v1506_v21  ;;  %v1716_v46 = vmax.f32 %v1652_v57, 0.0  ;;  %v1623_v21 = vadd.f32 %v1622_v56, %v3477_v25 }
 0x4d9   :  { %v1697_v43 = vadd.f32 %v3515_v49, %v1626_v9 }
 0x4da   :  { %v1721_v33 = vmax.f32 %v1657_v22, 0.0 }
 0x4db   :  { %v1761_v5 = vmax.f32 %v1697_v43, 0.0 }
 0x4dc   :  { %2280 = vmatpush.xpose.msk.msra.mxu2 %vm34_vm1, %v1745_v53  ;;  %v1736_v53 = vmax.f32 %v3543_v58, 0.0  ;;  %v1714_v58 = vmax.f32 %v1650_v17, 0.0 }
 0x4dd   :  { %v1508_v20 = vpop.f32.mrf.mxu2 }
 0x4de   :  { %v1509_v54 = vadd.f32 %v1508_v20, %v3477_v25  ;;  %v1735_v20 = vmax.f32 %v3540_v51, 0.0  ;;  %v1617_v51 = vadd.f32 %v3724_v15, %v3477_v25  ;;  %v1611_v15 = vadd.f32 %v3703_v24, %v3477_v25 }
 0x4df   :  { %v1754_v24 = vmax.f32 %v3599_v3, 0.0  ;;  %v1748_v3 = vmax.f32 %v3581_v41, 0.0 }
 0x4e0   :  { %2281 = vmatpush.xpose.msk.msra.mxu2 %vm34_vm1, %v1744_v10  ;;  %v1658_v60 = vadd.f32 %v3506_v30, %v1509_v54  ;;  %v1715_v10 = vmax.f32 %v1651_v16, 0.0  ;;  %v1734_v54 = vmax.f32 %v3537_v48, 0.0  ;;  %v1733_v30 = vmax.f32 %v3531_v39, 0.0 }
 0x4e1   :  { %v1732_v48 = vmax.f32 %v3528_v47, 0.0  ;;  %v1731_v39 = vmax.f32 %v3525_v14, 0.0  ;;  %v1730_v47 = vmax.f32 %v3522_v36, 0.0  ;;  %v1766_v36 = vrot.slane %v3474_v32, 6 }
 0x4e2   :  { %v1722_v42 = vmax.f32 %v1658_v60, 0.0  ;;  %v1696_v60 = vadd.f32 %v3515_v49, %v1623_v21  ;;  %v1750_v32 = vmax.f32 %v3587_v62, 0.0  ;;  %v2043_v62 = vlaneseq }
 0x4e3   :  { %2262 = vmatmul.msk.f32.vlgmr.msrb.gmra.mxu2 %vm34_vm1, %v1766_v36 }
 0x4e4   :  { %2282 = vmatpush.xpose.msk.msra.mxu2 %vm34_vm1, %v1743_v31  ;;  %2270 = vmatpush.xpose.msk.msrb.mxu0 %vm34_vm1, %v1722_v42  ;;  %v1620_v31 = vadd.f32 %v1619_v28, %v3477_v25  ;;  %v1760_v42 = vmax.f32 %v1696_v60, 0.0  ;;  %v1694_v28 = vadd.f32 %v3515_v49, %v1617_v51  ;;  %v2044_v12 = vand.u32 127, %v2043_v62 }
 0x4e6   :  { %v1695_v22 = vadd.f32 %v3515_v49, %v1620_v31  ;;  %v2047_v41 = vadd.s32 384, %v2044_v12  ;;  %v2048_v23 = vand.u32 15, %v2044_v12 }
 0x4e8   :  { %2283 = vmatpush.xpose.msk.msra.mxu2 %vm34_vm1, %v1742_v37  ;;  %2271 = vmatpush.xpose.msk.msrb.mxu0 %vm34_vm1, %v1721_v33  ;;  %v1614_v37 = vadd.f32 %v3716_v29, %v3477_v25  ;;  %v1759_v7 = vmax.f32 %v1695_v22, 0.0  ;;  %v1758_v33 = vmax.f32 %v1694_v28, 0.0  ;;  %v1692_v29 = vadd.f32 %v3515_v49, %v1611_v15 }
 0x4e9   :  { %v1755_v25 = vmax.f32 %v3617_v45, 0.0  ;;  %v1751_v45 = vmax.f32 %v3590_v52, 0.0  ;;  %v1746_v52 = vmax.f32 %v3575_v61, 0.0 }
 0x4ea   :  { %v1693_v50 = vadd.f32 %v3515_v49, %v1614_v37  ;;  %v1756_v14 = vmax.f32 %v1692_v29, 0.0  ;;  %v1753_v49 = vmax.f32 %v3596_v59, 0.0  ;;  %v1749_v59 = vmax.f32 %v3584_v4, 0.0 }
 0x4eb   :  { %v2046_v4 = vadd.s32 256, %v2044_v12 }
 0x4ec   :  { %2284 = vmatpush.xpose.msk.msra.mxu2 %vm34_vm1, %v1741_v13  ;;  %2272 = vmatpush.xpose.msk.msrb.mxu0 %vm34_vm1, %v1720_v27  ;;  %v1757_v13 = vmax.f32 %v1693_v50, 0.0 }
 0x4ed   :  { %v2054_v56 = vshra.s32 %v2046_v4, 4 }
 0x4ef   :  { %v2058_v44 = vand.u32 15, %v2054_v56 }
 0x4f0   :  { %2285 = vmatpush.xpose.msk.msra.mxu2 %vm34_vm1, %v1740_v2  ;;  %2273 = vmatpush.xpose.msk.msrb.mxu0 %vm34_vm1, %v1719_v1  ;;  %v2045_v2 = vadd.s32 128, %v2044_v12  ;;  %v1767_v1 = vrot.slane %v1765_v38, 5 }
 0x4f2   :  { %v2053_v55 = vshra.s32 %v2045_v2, 4  ;;  %v2049_v61 = vand.u32 15, %v2045_v2 }
 0x4f4   :  { %2286 = vmatpush.xpose.msk.msra.mxu2 %vm34_vm1, %v1739_v8  ;;  %2274 = vmatpush.xpose.msk.msrb.mxu0 %vm34_vm1, %v1718_v34  ;;  %v2050_v8 = vand.u32 15, %v2046_v4  ;;  %v2055_v34 = vshra.s32 %v2047_v41, 4  ;;  %v2057_v18 = vand.u32 15, %v2053_v55 }
 0x4f6   :  { %vm2062_vm10 = vcmp.ge.s32.totalorder %v2050_v8, %v2058_v44  ;;  %v2059_v6 = vand.u32 15, %v2055_v34  ;;  %vm2061_vm11 = vcmp.ge.s32.totalorder %v2049_v61, %v2057_v18 }
 0x4f8   :  { %2287 = vmatpush.xpose.msk.msra.mxu2 %vm34_vm1, %v1738_v19  ;;  %2275 = vmatpush.xpose.msk.msrb.mxu0 %vm34_vm1, %v1717_v63  ;;  %v2052_v19 = vshra.s32 %v2044_v12, 4 }
 0x4fa   :  { %v2056_v16 = vand.u32 15, %v2052_v19 }
 0x4fc   :  { %2288 = vmatpush.xpose.msk.msra.mxu2 %vm34_vm1, %v1737_v40  ;;  %2276 = vmatpush.xpose.msk.msrb.mxu0 %vm34_vm1, %v1716_v46  ;;  %v2051_v40 = vand.u32 15, %v2047_v41  ;;  %vm2060_vm13 = vcmp.ge.s32.totalorder %v2048_v23, %v2056_v16 }
 0x4fe   :  { %vm2063_vm12 = vcmp.ge.s32.totalorder %v2051_v40, %v2059_v6 }
 0x500   :  { %2289 = vmatpush.xpose.msk.msra.mxu2 %vm34_vm1, %v1736_v53  ;;  %2277 = vmatpush.xpose.msk.msrb.mxu0 %vm34_vm1, %v1715_v10 }
 0x504   :  { %2290 = vmatpush.xpose.msk.msra.mxu2 %vm34_vm1, %v1735_v20  ;;  %2278 = vmatpush.xpose.msk.msrb.mxu0 %vm34_vm1, %v1714_v58 }
 0x507   :  { %2279 = vmatmul.msk.f32.vlgmr.msrb.gmra.mxu0 %vm34_vm1, %v1766_v36 }
 0x508   :  { %2291 = vmatpush.xpose.msk.msra.mxu2 %vm34_vm1, %v1734_v54  ;;  %2297 = vmatpush.xpose.msk.msra.mxu0 %vm34_vm1, %v1761_v5 }
 0x50c   :  { %2292 = vmatpush.xpose.msk.msra.mxu2 %vm34_vm1, %v1733_v30  ;;  %2298 = vmatpush.xpose.msk.msra.mxu0 %vm34_vm1, %v1760_v42 }
 0x510   :  { %2293 = vmatpush.xpose.msk.msra.mxu2 %vm34_vm1, %v1732_v48  ;;  %2299 = vmatpush.xpose.msk.msra.mxu0 %vm34_vm1, %v1759_v7 }
 0x514   :  { %2294 = vmatpush.xpose.msk.msra.mxu2 %vm34_vm1, %v1731_v39  ;;  %2300 = vmatpush.xpose.msk.msra.mxu0 %vm34_vm1, %v1758_v33 }
 0x518   :  { %2295 = vmatpush.xpose.msk.msra.mxu2 %vm34_vm1, %v1730_v47  ;;  %2301 = vmatpush.xpose.msk.msra.mxu0 %vm34_vm1, %v1757_v13 }
 0x51b   :  { %2296 = vmatmul.msk.f32.vlgmr.msra.gmra.mxu2 %vm34_vm1, %v1766_v36 }
 0x51c   :  { %2302 = vmatpush.xpose.msk.msra.mxu0 %vm34_vm1, %v1756_v14 }
 0x520   :  { %2303 = vmatpush.xpose.msk.msra.mxu0 %vm34_vm1, %v1755_v25 }
 0x524   :  { %2304 = vmatpush.xpose.msk.msra.mxu0 %vm34_vm1, %v1754_v24 }
 0x528   :  { %2305 = vmatpush.xpose.msk.msra.mxu0 %vm34_vm1, %v1753_v49 }
 0x52c   :  { %2306 = vmatpush.xpose.msk.msra.mxu0 %vm34_vm1, %v1752_v35 }
 0x530   :  { %2307 = vmatpush.xpose.msk.msra.mxu0 %vm34_vm1, %v1751_v45 }
 0x534   :  { %2308 = vmatpush.xpose.msk.msra.mxu0 %vm34_vm1, %v1750_v32 }
 0x538   :  { %2309 = vmatpush.xpose.msk.msra.mxu0 %vm34_vm1, %v1749_v59 }
 0x53c   :  { %2310 = vmatpush.xpose.msk.msra.mxu0 %vm34_vm1, %v1748_v3 }
 0x540   :  { %2311 = vmatpush.xpose.msk.msra.mxu0 %vm34_vm1, %v1747_v0 }
 0x544   :  { %2312 = vmatpush.xpose.msk.msra.mxu0 %vm34_vm1, %v1746_v52 }
 0x547   :  { %2313 = vmatmul.msk.f32.vlgmr.msra.gmra.mxu0 %vm34_vm1, %v1766_v36  ;;  %vm2084_vm1 = vcmp.lt.s32.totalorder %v2043_v62, 512 }
 0x566   :  { %v1980_v27 = vpop.f32.mrf.mxu2 }
 0x567   :  { %v1981_v46 = vadd.f32 %v1980_v27, %v1767_v1 }
 0x569   :  { %v2064_v58 = vsel %vm2060_vm13, %v1981_v46, 0.0 }
 0x584   :  { %v2000_v11 = vpop.f32.mrf.mxu0 }
 0x585   :  { %v2001_v57 = vadd.f32 %v2000_v11, %v1767_v1 }
 0x587   :  { %v2065_v9 = vsel %vm2061_vm11, %v2001_v57, 0.0 }
 0x588   :  { %v2072_v21 = vrot.slane %v2065_v9, 7 }
 0x58a   :  { %v2076_v31 = vsel %vm2075_vm14, %v2064_v58, %v2072_v21 }
 0x59e   :  { %v2020_v26 = vpop.f32.mrf.mxu2 }
 0x59f   :  { %v2021_v63 = vadd.f32 %v2020_v26, %v1767_v1 }
 0x5a1   :  { %v2066_v53 = vsel %vm2062_vm10, %v2021_v63, 0.0 }
 0x5a2   :  { %v2073_v20 = vrot.slane %v2066_v53, 6 }
 0x5c4   :  { %v2040_v17 = vpop.f32.mrf.mxu0 }
 0x5c5   :  { %v2041_v10 = vadd.f32 %v2040_v17, %v1767_v1 }
 0x5c7   :  { %v2067_v43 = vsel %vm2063_vm12, %v2041_v10, 0.0 }
 0x5c8   :  { %v2074_v54 = vrot.slane %v2067_v43, 5 }
 0x5ca   :  { %v2078_v60 = vsel %vm2077_vm15, %v2073_v20, %v2074_v54 }
 0x5cb   :  { %v2080_v5 = vsel %vm2079_vm0, %v2076_v31, %v2078_v60 }
 0x5cc   :  { %2086 = vst.msk [vmem:[#allocation2] sm:$0xf] %vm2084_vm1, %v2080_v5 }
 0x5cd   :  { %2097 = dma.vmem_to_hbm [thread:$0]  %s2093_s21, 64, %s2095_s22, [#allocation3]  }
 0x5ce   :  { %2356 = dma.done.wait [#allocation3], 64  }
 0x5cf   :  { %2357 = vsyncadd [#allocation3], 4294967232 }
 0x5d0   :  { %2102 = vsyncpa [#allocation3], 1 }

</bundles_post_ra>
